<compile_context>
chip_gen: v6e
topology: v6e:2x2x1
jax: 0.10.0
libtpu: 0.0.40
codegen_flags: <defaults>
</compile_context>

<pallas_src>
import jax
import jax.numpy as jnp
from jax.experimental import pallas as pl
from jax.experimental.pallas import tpu as pltpu

EPS = 1e-5
C_IN, C_MID, C_OUT = 3, 32, 16       # channel sizes from the module
K1, STRIDE1, PAD1, DIL1 = 7, 2, 2, 2  # conv1 hyper-parameters
POOL = 2                              # MaxPool2d(2)
K2, S2 = 5, 2                         # conv2 kernel / stride (no pad, no bias)


def forward(x_nchw, w1, b1, gamma, beta, w2):
    n, c_in, h, w = x_nchw.shape
    assert c_in == C_IN
    # The even-grid gather below is hard-wired to conv1's exact
    # hyper-parameters; guard them explicitly (review correctness concern #3).
    assert (STRIDE1, PAD1, DIL1, K1) == (2, 2, 2, 7), "gather assumes these"
    assert h % 2 == 0 and w % 2 == 0, "wrapper assumes even H, W"

    x = jnp.transpose(x_nchw, (0, 2, 3, 1)).astype(jnp.float32)       # NHWC
    # Conv1 (stride=2, dilation=2, padding=2) only reads the even (h, w) grid
    # of the zero-padded input -> gather it once with a 1-pixel zero halo.
    xe = jnp.pad(x[:, ::2, ::2, :], ((0, 0), (1, 1), (1, 1), (0, 0)))
    he, we = xe.shape[1], xe.shape[2]
    oh1, ow1 = he - (K1 - 1), we - (K1 - 1)
    assert oh1 >= 1 and ow1 >= 1, "input too small for conv1"
    assert oh1 % POOL == 0 and ow1 % POOL == 0, "pool pairing assumes even"
    ph, pw = oh1 // POOL, ow1 // POOL
    assert ph >= K2 and pw >= K2, "input too small for conv2"
    oh2, ow2 = (ph - K2) // S2 + 1, (pw - K2) // S2 + 1
    lanes1 = ow1 * C_MID                              # lane-dense width (384)

    # ---- conv1 lhs: height-only im2col, lane-dense (N*OH1, K1*We*C_IN) -----
    xef = xe.reshape(n, he, we * C_IN)
    xcol = jnp.concatenate([xef[:, i:i + oh1, :] for i in range(K1)], axis=-1)
    xcol = xcol.reshape(n * oh1, K1 * we * C_IN)      # (24, 378)

    # ---- conv1 rhs: block-Toeplitz weights (width taps folded into K) ------
    w1f = w1.astype(jnp.float32)
    w5 = jnp.zeros((K1, we, C_IN, ow1, C_MID), jnp.float32)
    for ow in range(ow1):
        w5 = w5.at[:, ow:ow + K1, :, ow, :].set(w1f)
    wcol = w5.reshape(K1 * we * C_IN, lanes1)         # (378, 384)

    b1t = jnp.tile(b1.astype(jnp.float32), ow1).reshape(1, lanes1)
    g2 = gamma.astype(jnp.float32).reshape(1, C_MID)
    be2 = beta.astype(jnp.float32).reshape(1, C_MID)
    w2f = w2.astype(jnp.float32).reshape(K2 * K2 * C_MID, C_OUT)   # (800, 16)

    inv_cnt = 1.0 / float(n * oh1 * ow1)

    def kernel(xcol_ref, wcol_ref, b1t_ref, g_ref, be_ref, w2f_ref, o_ref):
        # ---- Conv1: ONE MXU matmul, lane-dense (N*OH1, OW1*C_MID) result ---
        c1 = jnp.dot(xcol_ref[...], wcol_ref[...],
                     preferred_element_type=jnp.float32) + b1t_ref[...]

        # ---- BatchNorm2d (batch stats): fused sum / sum-of-squares pass ----
        z = jnp.concatenate([c1, c1 * c1], axis=-1)            # (rows, 2*384)
        rs = jnp.sum(z, axis=0, keepdims=True)                 # (1, 768)
        s1 = rs[:, 0:C_MID]
        s2 = rs[:, lanes1:lanes1 + C_MID]
        for ow in range(1, ow1):                               # per-channel sums
            s1 = s1 + rs[:, ow * C_MID:(ow + 1) * C_MID]
            s2 = s2 + rs[:, lanes1 + ow * C_MID:lanes1 + (ow + 1) * C_MID]
        mean = s1 * inv_cnt                                    # (1, 32)
        var = jnp.maximum(s2 * inv_cnt - mean * mean, 0.0)
        scale32 = g_ref[...] * jax.lax.rsqrt(var + EPS)
        shift32 = be_ref[...] - mean * scale32
        scale = jnp.concatenate([scale32] * ow1, axis=-1)      # (1, 384)
        shift = jnp.concatenate([shift32] * ow1, axis=-1)
        y = c1 * scale + shift                                 # (24, 384)

        # ---- MaxPool2d(2) + ReLU on the lane-dense slab --------------------
        hm = jnp.max(y.reshape(n * ph, POOL, lanes1), axis=1)  # height pairs
        wm = jnp.maximum(hm[:, :(ow1 - 1) * C_MID], hm[:, C_MID:])  # width pairs
        wm = jnp.maximum(wm, 0.0)                              # ReLU
        # pooled[n, a, b, c] == wm3[n, a, 2*C_MID*b + c]
        wm3 = wm.reshape(n, ph, (ow1 - 1) * C_MID)

        # ---- Conv2 (5x5, stride 2) as ONE MXU dot, then Tanh, single store -
        rows = []
        for oy in range(oh2):
            for ox in range(ow2):
                parts = []
                for i in range(K2):
                    r = wm3[:, S2 * oy + i, :]                 # (n, 352)
                    for j in range(K2):
                        off = 2 * C_MID * (S2 * ox + j)
                        parts.append(r[:, off:off + C_MID])    # (n, 32)
                rows.append(jnp.concatenate(parts, axis=-1))   # (n, 800)
        lhs = rows[0] if len(rows) == 1 else jnp.concatenate(rows, axis=0)
        o_ref[...] = jnp.tanh(jnp.dot(lhs, w2f_ref[...],
                                      preferred_element_type=jnp.float32))

    flops = (2 * (n * oh1) * (K1 * we * C_IN) * lanes1
             + 2 * (oh2 * ow2 * n) * (K2 * K2 * C_MID) * C_OUT)
    bytes_accessed = 4 * (xcol.size + wcol.size + b1t.size + g2.size
                          + be2.size + w2f.size + oh2 * ow2 * n * C_OUT)

    vmem = pl.BlockSpec(memory_space=pltpu.MemorySpace.VMEM)
    out = pl.pallas_call(
        kernel,
        out_shape=jax.ShapeDtypeStruct((oh2 * ow2 * n, C_OUT), jnp.float32),
        in_specs=[vmem] * 6,
        out_specs=vmem,
        cost_estimate=pl.CostEstimate(
            flops=flops,
            transcendentals=C_MID + oh2 * ow2 * n * C_OUT,
            bytes_accessed=bytes_accessed),
    )(xcol, wcol, b1t, g2, be2, w2f)

    # (OH2*OW2*N, C_OUT) -> NCHW.  Spatial output is 1x1 here, so this is a
    # pure metadata reshape/transpose.
    return jnp.transpose(out.reshape(oh2, ow2, n, C_OUT), (2, 3, 0, 1))


# ------------------------------ pure-JAX reference -------------------------- #
def ref_forward(x_nchw, w1, b1, gamma, beta, w2):
    dn = ("NCHW", "HWIO", "NCHW")
    y = jax.lax.conv_general_dilated(x_nchw, w1, window_strides=(2, 2),
                                     padding=((2, 2), (2, 2)),
                                     rhs_dilation=(2, 2), dimension_numbers=dn)
    y = y + b1.reshape(1, -1, 1, 1)
    mean = y.mean(axis=(0, 2, 3), keepdims=True)
    var = ((y - mean) ** 2).mean(axis=(0, 2, 3), keepdims=True)
    y = (y - mean) * jax.lax.rsqrt(var + EPS) * gamma.reshape(1, -1, 1, 1) \
        + beta.reshape(1, -1, 1, 1)
    n, c, h, w = y.shape
    y = y[:, :, :h // 2 * 2, :w // 2 * 2].reshape(n, c, h // 2, 2, w // 2, 2)
    y = y.max(axis=(3, 5))
    y = jnp.maximum(y, 0.0)
    y = jax.lax.conv_general_dilated(y, w2, window_strides=(2, 2),
                                     padding="VALID", dimension_numbers=dn)
    return jnp.tanh(y)


if __name__ == "__main__":
    key = jax.random.PRNGKey(0)
    kx, k1, k2, k3 = jax.random.split(key, 4)

    # (2,3,8,8) from the repro makes conv1 empty (PyTorch errors); use 32x32.
    x = jax.random.normal(kx, (2, 3, 32, 32), jnp.float32)
    w1 = jax.random.normal(k1, (7, 7, 3, 32), jnp.float32) * 0.05   # HWIO
    b1 = jax.random.normal(k2, (32,), jnp.float32) * 0.1
    gamma = jnp.ones((32,), jnp.float32)    # BatchNorm2d default affine init
    beta = jnp.zeros((32,), jnp.float32)
    w2 = jax.random.normal(k3, (5, 5, 32, 16), jnp.float32) * 0.05  # HWIO

    out = jax.block_until_ready(jax.jit(forward)(x, w1, b1, gamma, beta, w2))

    ref = ref_forward(x, w1, b1, gamma, beta, w2)
    assert out.shape == (2, 16, 1, 1), out.shape
    max_err = float(jnp.max(jnp.abs(out - ref)))
    assert jnp.allclose(out, ref, atol=1e-3, rtol=1e-3), max_err
    print("KERNEL_OK")
</pallas_src>

<mosaic_0001>
module attributes {stable_mosaic.version = 11 : i64} {
  func.func @kernel(%arg0: memref<24x378xf32, #tpu.memory_space<vmem>>, %arg1: memref<378x384xf32, #tpu.memory_space<vmem>>, %arg2: memref<1x384xf32, #tpu.memory_space<vmem>>, %arg3: memref<1x32xf32, #tpu.memory_space<vmem>>, %arg4: memref<1x32xf32, #tpu.memory_space<vmem>>, %arg5: memref<800x16xf32, #tpu.memory_space<vmem>>, %arg6: memref<2x16xf32, #tpu.memory_space<vmem>>) attributes {dimension_semantics = [], scalar_prefetch = 0 : i64, scratch_operands = 0 : i64, tpu.core_type = #tpu.core_type<tc>} {
    %c0 = arith.constant 0 : index
    %c0_0 = arith.constant 0 : index
    %0 = vector.load %arg0[%c0, %c0_0] : memref<24x378xf32, #tpu.memory_space<vmem>>, vector<24x378xf32>
    %c0_1 = arith.constant 0 : index
    %c0_2 = arith.constant 0 : index
    %1 = vector.load %arg1[%c0_1, %c0_2] : memref<378x384xf32, #tpu.memory_space<vmem>>, vector<378x384xf32>
    %cst = arith.constant dense<0.000000e+00> : vector<24x384xf32>
    %2 = tpu.matmul %0, %1, %cst {dimension_numbers = #tpu.dot_dimension_numbers<[1], [0], [0], [1], [0, 0, 1, 1], [], []>} : vector<24x378xf32>, vector<378x384xf32>, vector<24x384xf32> -> vector<24x384xf32>
    %c0_3 = arith.constant 0 : index
    %c0_4 = arith.constant 0 : index
    %3 = vector.load %arg2[%c0_3, %c0_4] : memref<1x384xf32, #tpu.memory_space<vmem>>, vector<1x384xf32>
    %4 = vector.broadcast %3 : vector<1x384xf32> to vector<24x384xf32>
    %5 = arith.addf %2, %4 : vector<24x384xf32>
    %6 = arith.mulf %5, %5 : vector<24x384xf32>
    %7 = tpu.concatenate %5, %6 in 1 : vector<24x384xf32>, vector<24x384xf32> -> vector<24x768xf32>
    %cst_5 = arith.constant dense<0.000000e+00> : vector<768xf32>
    %8 = vector.multi_reduction <add>, %7, %cst_5 [0] : vector<24x768xf32> to vector<768xf32>
    %9 = vector.shape_cast %8 : vector<768xf32> to vector<1x768xf32>
    %10 = vector.extract_strided_slice %9 {offsets = [0, 0], sizes = [1, 32], strides = [1, 1]} : vector<1x768xf32> to vector<1x32xf32>
    %11 = vector.extract_strided_slice %9 {offsets = [0, 384], sizes = [1, 32], strides = [1, 1]} : vector<1x768xf32> to vector<1x32xf32>
    %12 = vector.extract_strided_slice %9 {offsets = [0, 32], sizes = [1, 32], strides = [1, 1]} : vector<1x768xf32> to vector<1x32xf32>
    %13 = arith.addf %10, %12 : vector<1x32xf32>
    %14 = vector.extract_strided_slice %9 {offsets = [0, 416], sizes = [1, 32], strides = [1, 1]} : vector<1x768xf32> to vector<1x32xf32>
    %15 = arith.addf %11, %14 : vector<1x32xf32>
    %16 = vector.extract_strided_slice %9 {offsets = [0, 64], sizes = [1, 32], strides = [1, 1]} : vector<1x768xf32> to vector<1x32xf32>
    %17 = arith.addf %13, %16 : vector<1x32xf32>
    %18 = vector.extract_strided_slice %9 {offsets = [0, 448], sizes = [1, 32], strides = [1, 1]} : vector<1x768xf32> to vector<1x32xf32>
    %19 = arith.addf %15, %18 : vector<1x32xf32>
    %20 = vector.extract_strided_slice %9 {offsets = [0, 96], sizes = [1, 32], strides = [1, 1]} : vector<1x768xf32> to vector<1x32xf32>
    %21 = arith.addf %17, %20 : vector<1x32xf32>
    %22 = vector.extract_strided_slice %9 {offsets = [0, 480], sizes = [1, 32], strides = [1, 1]} : vector<1x768xf32> to vector<1x32xf32>
    %23 = arith.addf %19, %22 : vector<1x32xf32>
    %24 = vector.extract_strided_slice %9 {offsets = [0, 128], sizes = [1, 32], strides = [1, 1]} : vector<1x768xf32> to vector<1x32xf32>
    %25 = arith.addf %21, %24 : vector<1x32xf32>
    %26 = vector.extract_strided_slice %9 {offsets = [0, 512], sizes = [1, 32], strides = [1, 1]} : vector<1x768xf32> to vector<1x32xf32>
    %27 = arith.addf %23, %26 : vector<1x32xf32>
    %28 = vector.extract_strided_slice %9 {offsets = [0, 160], sizes = [1, 32], strides = [1, 1]} : vector<1x768xf32> to vector<1x32xf32>
    %29 = arith.addf %25, %28 : vector<1x32xf32>
    %30 = vector.extract_strided_slice %9 {offsets = [0, 544], sizes = [1, 32], strides = [1, 1]} : vector<1x768xf32> to vector<1x32xf32>
    %31 = arith.addf %27, %30 : vector<1x32xf32>
    %32 = vector.extract_strided_slice %9 {offsets = [0, 192], sizes = [1, 32], strides = [1, 1]} : vector<1x768xf32> to vector<1x32xf32>
    %33 = arith.addf %29, %32 : vector<1x32xf32>
    %34 = vector.extract_strided_slice %9 {offsets = [0, 576], sizes = [1, 32], strides = [1, 1]} : vector<1x768xf32> to vector<1x32xf32>
    %35 = arith.addf %31, %34 : vector<1x32xf32>
    %36 = vector.extract_strided_slice %9 {offsets = [0, 224], sizes = [1, 32], strides = [1, 1]} : vector<1x768xf32> to vector<1x32xf32>
    %37 = arith.addf %33, %36 : vector<1x32xf32>
    %38 = vector.extract_strided_slice %9 {offsets = [0, 608], sizes = [1, 32], strides = [1, 1]} : vector<1x768xf32> to vector<1x32xf32>
    %39 = arith.addf %35, %38 : vector<1x32xf32>
    %40 = vector.extract_strided_slice %9 {offsets = [0, 256], sizes = [1, 32], strides = [1, 1]} : vector<1x768xf32> to vector<1x32xf32>
    %41 = arith.addf %37, %40 : vector<1x32xf32>
    %42 = vector.extract_strided_slice %9 {offsets = [0, 640], sizes = [1, 32], strides = [1, 1]} : vector<1x768xf32> to vector<1x32xf32>
    %43 = arith.addf %39, %42 : vector<1x32xf32>
    %44 = vector.extract_strided_slice %9 {offsets = [0, 288], sizes = [1, 32], strides = [1, 1]} : vector<1x768xf32> to vector<1x32xf32>
    %45 = arith.addf %41, %44 : vector<1x32xf32>
    %46 = vector.extract_strided_slice %9 {offsets = [0, 672], sizes = [1, 32], strides = [1, 1]} : vector<1x768xf32> to vector<1x32xf32>
    %47 = arith.addf %43, %46 : vector<1x32xf32>
    %48 = vector.extract_strided_slice %9 {offsets = [0, 320], sizes = [1, 32], strides = [1, 1]} : vector<1x768xf32> to vector<1x32xf32>
    %49 = arith.addf %45, %48 : vector<1x32xf32>
    %50 = vector.extract_strided_slice %9 {offsets = [0, 704], sizes = [1, 32], strides = [1, 1]} : vector<1x768xf32> to vector<1x32xf32>
    %51 = arith.addf %47, %50 : vector<1x32xf32>
    %52 = vector.extract_strided_slice %9 {offsets = [0, 352], sizes = [1, 32], strides = [1, 1]} : vector<1x768xf32> to vector<1x32xf32>
    %53 = arith.addf %49, %52 : vector<1x32xf32>
    %54 = vector.extract_strided_slice %9 {offsets = [0, 736], sizes = [1, 32], strides = [1, 1]} : vector<1x768xf32> to vector<1x32xf32>
    %55 = arith.addf %51, %54 : vector<1x32xf32>
    %cst_6 = arith.constant 0.00347222225 : f32
    %56 = vector.broadcast %cst_6 : f32 to vector<1x32xf32>
    %57 = arith.mulf %53, %56 : vector<1x32xf32>
    %cst_7 = arith.constant 0.00347222225 : f32
    %58 = vector.broadcast %cst_7 : f32 to vector<1x32xf32>
    %59 = arith.mulf %55, %58 : vector<1x32xf32>
    %60 = arith.mulf %57, %57 : vector<1x32xf32>
    %61 = arith.subf %59, %60 : vector<1x32xf32>
    %cst_8 = arith.constant 0.000000e+00 : f32
    %62 = vector.broadcast %cst_8 : f32 to vector<1x32xf32>
    %63 = arith.maximumf %61, %62 : vector<1x32xf32>
    %c0_9 = arith.constant 0 : index
    %c0_10 = arith.constant 0 : index
    %64 = vector.load %arg3[%c0_9, %c0_10] : memref<1x32xf32, #tpu.memory_space<vmem>>, vector<1x32xf32>
    %cst_11 = arith.constant 9.99999974E-6 : f32
    %65 = vector.broadcast %cst_11 : f32 to vector<1x32xf32>
    %66 = arith.addf %63, %65 : vector<1x32xf32>
    %67 = math.rsqrt %66 : vector<1x32xf32>
    %68 = arith.mulf %64, %67 : vector<1x32xf32>
    %c0_12 = arith.constant 0 : index
    %c0_13 = arith.constant 0 : index
    %69 = vector.load %arg4[%c0_12, %c0_13] : memref<1x32xf32, #tpu.memory_space<vmem>>, vector<1x32xf32>
    %70 = arith.mulf %57, %68 : vector<1x32xf32>
    %71 = arith.subf %69, %70 : vector<1x32xf32>
    %72 = tpu.concatenate %68, %68, %68, %68, %68, %68, %68, %68, %68, %68, %68, %68 in 1 : vector<1x32xf32>, vector<1x32xf32>, vector<1x32xf32>, vector<1x32xf32>, vector<1x32xf32>, vector<1x32xf32>, vector<1x32xf32>, vector<1x32xf32>, vector<1x32xf32>, vector<1x32xf32>, vector<1x32xf32>, vector<1x32xf32> -> vector<1x384xf32>
    %73 = tpu.concatenate %71, %71, %71, %71, %71, %71, %71, %71, %71, %71, %71, %71 in 1 : vector<1x32xf32>, vector<1x32xf32>, vector<1x32xf32>, vector<1x32xf32>, vector<1x32xf32>, vector<1x32xf32>, vector<1x32xf32>, vector<1x32xf32>, vector<1x32xf32>, vector<1x32xf32>, vector<1x32xf32>, vector<1x32xf32> -> vector<1x384xf32>
    %74 = vector.broadcast %72 : vector<1x384xf32> to vector<24x384xf32>
    %75 = arith.mulf %5, %74 : vector<24x384xf32>
    %76 = vector.broadcast %73 : vector<1x384xf32> to vector<24x384xf32>
    %77 = arith.addf %75, %76 : vector<24x384xf32>
    %78 = vector.shape_cast %77 : vector<24x384xf32> to vector<12x2x384xf32>
    %cst_14 = arith.constant dense<0xFF800000> : vector<12x384xf32>
    %79 = vector.multi_reduction <maximumf>, %78, %cst_14 [1] : vector<12x2x384xf32> to vector<12x384xf32>
    %80 = vector.extract_strided_slice %79 {offsets = [0, 0], sizes = [12, 352], strides = [1, 1]} : vector<12x384xf32> to vector<12x352xf32>
    %81 = vector.extract_strided_slice %79 {offsets = [0, 32], sizes = [12, 352], strides = [1, 1]} : vector<12x384xf32> to vector<12x352xf32>
    %82 = arith.maximumf %80, %81 : vector<12x352xf32>
    %cst_15 = arith.constant 0.000000e+00 : f32
    %83 = vector.broadcast %cst_15 : f32 to vector<12x352xf32>
    %84 = arith.maximumf %82, %83 : vector<12x352xf32>
    %85 = vector.shape_cast %84 : vector<12x352xf32> to vector<2x6x352xf32>
    %86 = vector.extract_strided_slice %85 {offsets = [0, 0, 0], sizes = [2, 1, 352], strides = [1, 1, 1]} : vector<2x6x352xf32> to vector<2x1x352xf32>
    %87 = vector.shape_cast %86 : vector<2x1x352xf32> to vector<2x352xf32>
    %88 = vector.extract_strided_slice %87 {offsets = [0, 0], sizes = [2, 32], strides = [1, 1]} : vector<2x352xf32> to vector<2x32xf32>
    %89 = vector.extract_strided_slice %87 {offsets = [0, 64], sizes = [2, 32], strides = [1, 1]} : vector<2x352xf32> to vector<2x32xf32>
    %90 = vector.extract_strided_slice %87 {offsets = [0, 128], sizes = [2, 32], strides = [1, 1]} : vector<2x352xf32> to vector<2x32xf32>
    %91 = vector.extract_strided_slice %87 {offsets = [0, 192], sizes = [2, 32], strides = [1, 1]} : vector<2x352xf32> to vector<2x32xf32>
    %92 = vector.extract_strided_slice %87 {offsets = [0, 256], sizes = [2, 32], strides = [1, 1]} : vector<2x352xf32> to vector<2x32xf32>
    %93 = vector.extract_strided_slice %85 {offsets = [0, 1, 0], sizes = [2, 1, 352], strides = [1, 1, 1]} : vector<2x6x352xf32> to vector<2x1x352xf32>
    %94 = vector.shape_cast %93 : vector<2x1x352xf32> to vector<2x352xf32>
    %95 = vector.extract_strided_slice %94 {offsets = [0, 0], sizes = [2, 32], strides = [1, 1]} : vector<2x352xf32> to vector<2x32xf32>
    %96 = vector.extract_strided_slice %94 {offsets = [0, 64], sizes = [2, 32], strides = [1, 1]} : vector<2x352xf32> to vector<2x32xf32>
    %97 = vector.extract_strided_slice %94 {offsets = [0, 128], sizes = [2, 32], strides = [1, 1]} : vector<2x352xf32> to vector<2x32xf32>
    %98 = vector.extract_strided_slice %94 {offsets = [0, 192], sizes = [2, 32], strides = [1, 1]} : vector<2x352xf32> to vector<2x32xf32>
    %99 = vector.extract_strided_slice %94 {offsets = [0, 256], sizes = [2, 32], strides = [1, 1]} : vector<2x352xf32> to vector<2x32xf32>
    %100 = vector.extract_strided_slice %85 {offsets = [0, 2, 0], sizes = [2, 1, 352], strides = [1, 1, 1]} : vector<2x6x352xf32> to vector<2x1x352xf32>
    %101 = vector.shape_cast %100 : vector<2x1x352xf32> to vector<2x352xf32>
    %102 = vector.extract_strided_slice %101 {offsets = [0, 0], sizes = [2, 32], strides = [1, 1]} : vector<2x352xf32> to vector<2x32xf32>
    %103 = vector.extract_strided_slice %101 {offsets = [0, 64], sizes = [2, 32], strides = [1, 1]} : vector<2x352xf32> to vector<2x32xf32>
    %104 = vector.extract_strided_slice %101 {offsets = [0, 128], sizes = [2, 32], strides = [1, 1]} : vector<2x352xf32> to vector<2x32xf32>
    %105 = vector.extract_strided_slice %101 {offsets = [0, 192], sizes = [2, 32], strides = [1, 1]} : vector<2x352xf32> to vector<2x32xf32>
    %106 = vector.extract_strided_slice %101 {offsets = [0, 256], sizes = [2, 32], strides = [1, 1]} : vector<2x352xf32> to vector<2x32xf32>
    %107 = vector.extract_strided_slice %85 {offsets = [0, 3, 0], sizes = [2, 1, 352], strides = [1, 1, 1]} : vector<2x6x352xf32> to vector<2x1x352xf32>
    %108 = vector.shape_cast %107 : vector<2x1x352xf32> to vector<2x352xf32>
    %109 = vector.extract_strided_slice %108 {offsets = [0, 0], sizes = [2, 32], strides = [1, 1]} : vector<2x352xf32> to vector<2x32xf32>
    %110 = vector.extract_strided_slice %108 {offsets = [0, 64], sizes = [2, 32], strides = [1, 1]} : vector<2x352xf32> to vector<2x32xf32>
    %111 = vector.extract_strided_slice %108 {offsets = [0, 128], sizes = [2, 32], strides = [1, 1]} : vector<2x352xf32> to vector<2x32xf32>
    %112 = vector.extract_strided_slice %108 {offsets = [0, 192], sizes = [2, 32], strides = [1, 1]} : vector<2x352xf32> to vector<2x32xf32>
    %113 = vector.extract_strided_slice %108 {offsets = [0, 256], sizes = [2, 32], strides = [1, 1]} : vector<2x352xf32> to vector<2x32xf32>
    %114 = vector.extract_strided_slice %85 {offsets = [0, 4, 0], sizes = [2, 1, 352], strides = [1, 1, 1]} : vector<2x6x352xf32> to vector<2x1x352xf32>
    %115 = vector.shape_cast %114 : vector<2x1x352xf32> to vector<2x352xf32>
    %116 = vector.extract_strided_slice %115 {offsets = [0, 0], sizes = [2, 32], strides = [1, 1]} : vector<2x352xf32> to vector<2x32xf32>
    %117 = vector.extract_strided_slice %115 {offsets = [0, 64], sizes = [2, 32], strides = [1, 1]} : vector<2x352xf32> to vector<2x32xf32>
    %118 = vector.extract_strided_slice %115 {offsets = [0, 128], sizes = [2, 32], strides = [1, 1]} : vector<2x352xf32> to vector<2x32xf32>
    %119 = vector.extract_strided_slice %115 {offsets = [0, 192], sizes = [2, 32], strides = [1, 1]} : vector<2x352xf32> to vector<2x32xf32>
    %120 = vector.extract_strided_slice %115 {offsets = [0, 256], sizes = [2, 32], strides = [1, 1]} : vector<2x352xf32> to vector<2x32xf32>
    %121 = tpu.concatenate %88, %89, %90, %91, %92, %95, %96, %97, %98, %99, %102, %103, %104, %105, %106, %109 in 1 : vector<2x32xf32>, vector<2x32xf32>, vector<2x32xf32>, vector<2x32xf32>, vector<2x32xf32>, vector<2x32xf32>, vector<2x32xf32>, vector<2x32xf32>, vector<2x32xf32>, vector<2x32xf32>, vector<2x32xf32>, vector<2x32xf32>, vector<2x32xf32>, vector<2x32xf32>, vector<2x32xf32>, vector<2x32xf32> -> vector<2x512xf32>
    %122 = tpu.concatenate %110, %111, %112, %113, %116, %117, %118, %119, %120 in 1 : vector<2x32xf32>, vector<2x32xf32>, vector<2x32xf32>, vector<2x32xf32>, vector<2x32xf32>, vector<2x32xf32>, vector<2x32xf32>, vector<2x32xf32>, vector<2x32xf32> -> vector<2x288xf32>
    %123 = tpu.concatenate %121, %122 in 1 : vector<2x512xf32>, vector<2x288xf32> -> vector<2x800xf32>
    %c0_16 = arith.constant 0 : index
    %c0_17 = arith.constant 0 : index
    %124 = vector.load %arg5[%c0_16, %c0_17] : memref<800x16xf32, #tpu.memory_space<vmem>>, vector<800x16xf32>
    %cst_18 = arith.constant dense<0.000000e+00> : vector<2x16xf32>
    %125 = tpu.matmul %123, %124, %cst_18 {dimension_numbers = #tpu.dot_dimension_numbers<[1], [0], [0], [1], [0, 0, 1, 1], [], []>} : vector<2x800xf32>, vector<800x16xf32>, vector<2x16xf32> -> vector<2x16xf32>
    %126 = math.tanh %125 : vector<2x16xf32>
    %c0_19 = arith.constant 0 : index
    %c0_20 = arith.constant 0 : index
    %127 = vector.load %arg6[%c0_19, %c0_20] : memref<2x16xf32, #tpu.memory_space<vmem>>, vector<2x16xf32>
    tpu.vector_store %arg6[%c0_19, %c0_20], %126 {strides = array<i32>} : memref<2x16xf32, #tpu.memory_space<vmem>>, vector<2x16xf32>,
    return
  }
}

</mosaic_0001>

<bundles_post_ra>
// kernel: tile.8
= control target key start
LH: loop header
LB: loop body
LE: loop exit
PB: predicated region body
PF: predicated region fallthrough
CT: control target
= control target key end

     0   :  { %s28_s0 = inlined_call_operand.vmem [shape: f32[32], index: 0, kind: input, shape index: {}]   ;;  %s29_s1 = inlined_call_operand.vmem [shape: f32[12,32], index: 1, kind: output, shape index: {}]  }
   0x1   :  { %v4_v0 = vld [vmem:[%s28_s0] ss:$0 sm:$0xff] }
   0x2   :  { %5 = vst [vmem:[%s29_s1] sm:$0xff] %v4_v0  ;;  %8 = vst [vmem:[%s29_s1 + $0x8] sm:$0xff] %v4_v0 }

// kernel: tile.9
= control target key start
LH: loop header
LB: loop body
LE: loop exit
PB: predicated region body
PF: predicated region fallthrough
CT: control target
= control target key end

     0   :  { %s53_s8 = smov 96   ;;  %vm3_vm0 = vcmask 261120   ;;  %s55_s15 = smov 64   ;;  %vm9_vm1 = vcmask 1048320   ;;  %vm15_vm2 = vcmask 785920   ;;  %vm21_vm3 = vcmask 523520   ;;  %s87_s0 = inlined_call_operand.vmem [shape: f32[12,32], index: 0, kind: input, shape index: {}]   ;;  %s88_s1 = inlined_call_operand.vmem [shape: f32[1,384], index: 1, kind: output, shape index: {}]  }
   0x1   :  { %v45_v0 = vld [vmem:[%s87_s0 + $0x3] ss:$4 sm:$0x7]   ;;  %v46_v1 = vld [vmem:[%s87_s0 + $0x2] ss:$4 sm:$0x7]  }
   0x2   :  { %7 = vrot.lane.b32.xlu0 %v45_v0, %s53_s8  ;;  %v47_v2 = vld [vmem:[%s87_s0 + $0x1] ss:$4 sm:$0x7]   ;;  %v2_v3 = vld [vmem:[%s87_s0] ss:$4 sm:$0x7]  }
   0x3   :  { %s54_s0 = smov 32   ;;  %4 = vst.msk [vmem:[#allocation0] ss:$8 sm:$0x7] %vm3_vm0, %v2_v3  }
   0x4   :  { %19 = vrot.lane.b32.xlu1 %v47_v2, %s54_s0 }
   0x6   :  { %13 = vrot.lane.b32.xlu0 %v46_v1, %s55_s15 }
  0x74   :  { %v8_v4 = vpop.permute.xlu0 %7  }
  0x75   :  { %10 = vst.msk [vmem:[#allocation0] ss:$8 sm:$0x7] %vm9_vm1, %v8_v4  }
  0x76   :  { %v20_v5 = vpop.permute.xlu1 %19  }
  0x78   :  { %v14_v6 = vpop.permute.xlu0 %13  }
  0x79   :  { %16 = vst.msk [vmem:[#allocation0] ss:$8 sm:$0x7] %vm15_vm2, %v14_v6  }
  0x7a   :  { %22 = vst.msk [vmem:[#allocation0] ss:$8 sm:$0x7] %vm21_vm3, %v20_v5  }
  0x81   :  { %v27_v7 = vld [vmem:[#allocation0] sm:$0x1]  ;;  %v32_v8 = vld [vmem:[#allocation0 + $0x8] sm:$0x1]  ;;  %v38_v9 = vld [vmem:[#allocation0 + $0x10] sm:$0x1] }
  0x82   :  { %30 = vst [vmem:[%s88_s1] sm:$0x1] %v27_v7  ;;  %48 = vst [vmem:[%s88_s1 + $0x1] sm:$0x1] %v32_v8 }
  0x83   :  { %49 = vst [vmem:[%s88_s1 + $0x2] sm:$0x1] %v38_v9 }

// kernel: forward.1
= control target key start
LH: loop header
LB: loop body
LE: loop exit
PB: predicated region body
PF: predicated region fallthrough
CT: control target
= control target key end

     0   :  { %v2379_v4 = vmov 0.0   ;;  %vm204_vm0 = vcmask 1041408   ;;  %vm194_vm1 = vcmask 998400   ;;  %s3799_s0 = inlined_call_operand.vmem [shape: f32[24,378], index: 0, kind: input, shape index: {}]   ;;  %s3800_s1 = inlined_call_operand.vmem [shape: f32[378,384], index: 1, kind: input, shape index: {}]   ;;  %s3801_s2 = inlined_call_operand.vmem [shape: f32[1,384], index: 2, kind: input, shape index: {}]   ;;  %s3802_s3 = inlined_call_operand.vmem [shape: f32[1,32], index: 3, kind: input, shape index: {}]   ;;  %s3803_s4 = inlined_call_operand.vmem [shape: f32[1,32], index: 4, kind: input, shape index: {}]   ;;  %s3804_s5 = inlined_call_operand.vmem [shape: f32[800,16], index: 5, kind: input, shape index: {}]   ;;  %s3805_s6 = inlined_call_operand.hbm [shape: f32[2,16], index: 6, kind: output, shape index: {}]  }
   0x1   :  { %v79_v0 = vld [vmem:[%s3800_s1 + $0x170] sm:$0xff]  ;;  %v78_v1 = vld [vmem:[%s3800_s1 + $0x168] sm:$0xff]  ;;  %v76_v2 = vld [vmem:[%s3800_s1 + $0x158] sm:$0xff]  ;;  %361 = vmatprep.mubr.f32.mxu1 %v2379_v4 }
   0x2   :  { %214 = vmatprep.subr.mxu0 %v79_v0  ;;  %v75_v3 = vld [vmem:[%s3800_s1 + $0x150] sm:$0xff]  ;;  %v73_v5 = vld [vmem:[%s3800_s1 + $0x140] sm:$0xff]  ;;  %v72_v6 = vld [vmem:[%s3800_s1 + $0x138] sm:$0xff] }
   0x3   :  { %215 = vmatpush1.msra.mxu0 %v78_v1  ;;  %v70_v7 = vld [vmem:[%s3800_s1 + $0x128] sm:$0xff]  ;;  %v69_v8 = vld [vmem:[%s3800_s1 + $0x120] sm:$0xff]  ;;  %v67_v9 = vld [vmem:[%s3800_s1 + $0x110] sm:$0xff] }
   0x4   :  { %216 = vmatprep.subr.mxu0 %v76_v2  ;;  %v66_v10 = vld [vmem:[%s3800_s1 + $0x108] sm:$0xff]  ;;  %v64_v11 = vld [vmem:[%s3800_s1 + $0xf8] sm:$0xff]  ;;  %v175_v12 = vld [vmem:[%s3800_s1 + $0x470] sm:$0x3] }
   0x5   :  { %217 = vmatpush1.msra.mxu0 %v75_v3  ;;  %v63_v13 = vld [vmem:[%s3800_s1 + $0xf0] sm:$0xff]  ;;  %2004 = vmatprep.subr.msk.mxu1 %vm204_vm0, %v175_v12  ;;  %v174_v14 = vld [vmem:[%s3800_s1 + $0x468] sm:$0x3]  ;;  %v172_v15 = vld [vmem:[%s3800_s1 + $0x458] sm:$0xff] }
   0x6   :  { %218 = vmatprep.subr.mxu0 %v73_v5  ;;  %v61_v16 = vld [vmem:[%s3800_s1 + $0xe0] sm:$0xff]  ;;  %2005 = vmatpush1.msk.msra.mxu1 %vm204_vm0, %v174_v14  ;;  %v171_v17 = vld [vmem:[%s3800_s1 + $0x450] sm:$0xff]  ;;  %v60_v18 = vld [vmem:[%s3800_s1 + $0xd8] sm:$0xff] }
   0x7   :  { %219 = vmatpush1.msra.mxu0 %v72_v6  ;;  %299 = vmatprep.subr.mxu1 %v172_v15  ;;  %v169_v19 = vld [vmem:[%s3800_s1 + $0x440] sm:$0xff]  ;;  %v168_v20 = vld [vmem:[%s3800_s1 + $0x438] sm:$0xff]  ;;  %v58_v21 = vld [vmem:[%s3800_s1 + $0xc8] sm:$0xff] }
   0x8   :  { %220 = vmatprep.subr.mxu0 %v70_v7  ;;  %300 = vmatpush1.msra.mxu1 %v171_v17  ;;  %v166_v22 = vld [vmem:[%s3800_s1 + $0x428] sm:$0xff]  ;;  %v57_v23 = vld [vmem:[%s3800_s1 + $0xc0] sm:$0xff]  ;;  %v55_v25 = vld [vmem:[%s3800_s1 + $0xb0] sm:$0xff] }
   0x9   :  { %221 = vmatpush1.msra.mxu0 %v69_v8  ;;  %301 = vmatprep.subr.mxu1 %v169_v19  ;;  %v165_v24 = vld [vmem:[%s3800_s1 + $0x420] sm:$0xff]  ;;  %v163_v26 = vld [vmem:[%s3800_s1 + $0x410] sm:$0xff]  ;;  %v54_v27 = vld [vmem:[%s3800_s1 + $0xa8] sm:$0xff] }
   0xa   :  { %222 = vmatprep.subr.mxu0 %v67_v9  ;;  %302 = vmatpush1.msra.mxu1 %v168_v20  ;;  %v162_v28 = vld [vmem:[%s3800_s1 + $0x408] sm:$0xff]  ;;  %v52_v29 = vld [vmem:[%s3800_s1 + $0x98] sm:$0xff]  ;;  %v51_v31 = vld [vmem:[%s3800_s1 + $0x90] sm:$0xff] }
   0xb   :  { %223 = vmatpush1.msra.mxu0 %v66_v10  ;;  %303 = vmatprep.subr.mxu1 %v166_v22  ;;  %v160_v30 = vld [vmem:[%s3800_s1 + $0x3f8] sm:$0xff]  ;;  %v159_v32 = vld [vmem:[%s3800_s1 + $0x3f0] sm:$0xff]  ;;  %v49_v33 = vld [vmem:[%s3800_s1 + $0x80] sm:$0xff] }
   0xc   :  { %224 = vmatprep.subr.mxu0 %v64_v11  ;;  %304 = vmatpush1.msra.mxu1 %v165_v24  ;;  %v157_v34 = vld [vmem:[%s3800_s1 + $0x3e0] sm:$0xff]  ;;  %v48_v35 = vld [vmem:[%s3800_s1 + $0x78] sm:$0xff]  ;;  %v46_v37 = vld [vmem:[%s3800_s1 + $0x68] sm:$0xff] }
   0xd   :  { %225 = vmatpush1.msra.mxu0 %v63_v13  ;;  %305 = vmatprep.subr.mxu1 %v163_v26  ;;  %v156_v36 = vld [vmem:[%s3800_s1 + $0x3d8] sm:$0xff]  ;;  %v154_v38 = vld [vmem:[%s3800_s1 + $0x3c8] sm:$0xff]  ;;  %v45_v39 = vld [vmem:[%s3800_s1 + $0x60] sm:$0xff] }
   0xe   :  { %226 = vmatprep.subr.mxu0 %v61_v16  ;;  %306 = vmatpush1.msra.mxu1 %v162_v28  ;;  %v153_v40 = vld [vmem:[%s3800_s1 + $0x3c0] sm:$0xff]  ;;  %v43_v41 = vld [vmem:[%s3800_s1 + $0x50] sm:$0xff]  ;;  %v42_v43 = vld [vmem:[%s3800_s1 + $0x48] sm:$0xff] }
   0xf   :  { %227 = vmatpush1.msra.mxu0 %v60_v18  ;;  %307 = vmatprep.subr.mxu1 %v160_v30  ;;  %v151_v42 = vld [vmem:[%s3800_s1 + $0x3b0] sm:$0xff]  ;;  %v150_v44 = vld [vmem:[%s3800_s1 + $0x3a8] sm:$0xff]  ;;  %v40_v45 = vld [vmem:[%s3800_s1 + $0x38] sm:$0xff] }
  0x10   :  { %228 = vmatprep.subr.mxu0 %v58_v21  ;;  %308 = vmatpush1.msra.mxu1 %v159_v32  ;;  %v148_v46 = vld [vmem:[%s3800_s1 + $0x398] sm:$0xff]  ;;  %v39_v47 = vld [vmem:[%s3800_s1 + $0x30] sm:$0xff]  ;;  %v37_v49 = vld [vmem:[%s3800_s1 + $0x20] sm:$0xff] }
  0x11   :  { %229 = vmatpush1.msra.mxu0 %v57_v23  ;;  %309 = vmatprep.subr.mxu1 %v157_v34  ;;  %v147_v48 = vld [vmem:[%s3800_s1 + $0x390] sm:$0xff]  ;;  %v145_v50 = vld [vmem:[%s3800_s1 + $0x380] sm:$0xff]  ;;  %v36_v51 = vld [vmem:[%s3800_s1 + $0x18] sm:$0xff] }
  0x12   :  { %230 = vmatprep.subr.mxu0 %v55_v25  ;;  %310 = vmatpush1.msra.mxu1 %v156_v36  ;;  %v144_v52 = vld [vmem:[%s3800_s1 + $0x378] sm:$0xff]  ;;  %v34_v53 = vld [vmem:[%s3800_s1 + $0x8] sm:$0xff]  ;;  %v33_v55 = vld [vmem:[%s3800_s1] sm:$0xff] }
  0x13   :  { %231 = vmatpush1.msra.mxu0 %v54_v27  ;;  %311 = vmatprep.subr.mxu1 %v154_v38  ;;  %v142_v54 = vld [vmem:[%s3800_s1 + $0x368] sm:$0xff]  ;;  %v141_v56 = vld [vmem:[%s3800_s1 + $0x360] sm:$0xff]  ;;  %v127_v57 = vld [vmem:[%s3800_s1 + $0x2f0] sm:$0xff] }
  0x14   :  { %232 = vmatprep.subr.mxu0 %v52_v29  ;;  %312 = vmatpush1.msra.mxu1 %v153_v40  ;;  %v139_v58 = vld [vmem:[%s3800_s1 + $0x350] sm:$0xff]  ;;  %v126_v59 = vld [vmem:[%s3800_s1 + $0x2e8] sm:$0xff]  ;;  %v124_v61 = vld [vmem:[%s3800_s1 + $0x2d8] sm:$0xff] }
  0x15   :  { %233 = vmatpush1.msra.mxu0 %v51_v31  ;;  %313 = vmatprep.subr.mxu1 %v151_v42  ;;  %v138_v60 = vld [vmem:[%s3800_s1 + $0x348] sm:$0xff]  ;;  %v136_v62 = vld [vmem:[%s3800_s1 + $0x338] sm:$0xff]  ;;  %v123_v63 = vld [vmem:[%s3800_s1 + $0x2d0] sm:$0xff] }
  0x16   :  { %234 = vmatprep.subr.mxu0 %v49_v33  ;;  %314 = vmatpush1.msra.mxu1 %v150_v44  ;;  %v135_v0 = vld [vmem:[%s3800_s1 + $0x330] sm:$0xff]  ;;  %v121_v1 = vld [vmem:[%s3800_s1 + $0x2c0] sm:$0xff]  ;;  %v120_v3 = vld [vmem:[%s3800_s1 + $0x2b8] sm:$0xff] }
  0x17   :  { %235 = vmatpush1.msra.mxu0 %v48_v35  ;;  %315 = vmatprep.subr.mxu1 %v148_v46  ;;  %v133_v2 = vld [vmem:[%s3800_s1 + $0x320] sm:$0xff]  ;;  %v132_v5 = vld [vmem:[%s3800_s1 + $0x318] sm:$0xff]  ;;  %v118_v6 = vld [vmem:[%s3800_s1 + $0x2a8] sm:$0xff] }
  0x18   :  { %236 = vmatprep.subr.mxu0 %v46_v37  ;;  %316 = vmatpush1.msra.mxu1 %v147_v48  ;;  %v130_v7 = vld [vmem:[%s3800_s1 + $0x308] sm:$0xff]  ;;  %v117_v8 = vld [vmem:[%s3800_s1 + $0x2a0] sm:$0xff]  ;;  %v115_v10 = vld [vmem:[%s3800_s1 + $0x290] sm:$0xff] }
  0x19   :  { %237 = vmatpush1.msra.mxu0 %v45_v39  ;;  %317 = vmatprep.subr.mxu1 %v145_v50  ;;  %v129_v9 = vld [vmem:[%s3800_s1 + $0x300] sm:$0xff]  ;;  %v128_v11 = vld [vmem:[%s3800_s1 + $0x2f8] sm:$0xff]  ;;  %v114_v12 = vld [vmem:[%s3800_s1 + $0x288] sm:$0xff] }
  0x1a   :  { %238 = vmatprep.subr.mxu0 %v43_v41  ;;  %318 = vmatpush1.msra.mxu1 %v144_v52  ;;  %v2652_v13 = vld [vmem:[%s3799_s0 + $0x10] sm:$0xff]  ;;  %v112_v14 = vld [vmem:[%s3800_s1 + $0x278] sm:$0xff]  ;;  %v125_v17 = vld [vmem:[%s3800_s1 + $0x2e0] sm:$0xff] }
  0x1b   :  { %239 = vmatpush1.msra.mxu0 %v42_v43  ;;  %319 = vmatprep.subr.mxu1 %v142_v54  ;;  %v80_v15 = vld [vmem:[%s3800_s1 + $0x178] sm:$0xff]  ;;  %v111_v16 = vld [vmem:[%s3800_s1 + $0x270] sm:$0xff]  ;;  %v109_v18 = vld [vmem:[%s3800_s1 + $0x260] sm:$0xff] }
  0x1c   :  { %240 = vmatprep.subr.mxu0 %v40_v45  ;;  %320 = vmatpush1.msra.mxu1 %v141_v56  ;;  %v77_v19 = vld [vmem:[%s3800_s1 + $0x160] sm:$0xff]  ;;  %v108_v20 = vld [vmem:[%s3800_s1 + $0x258] sm:$0xff]  ;;  %v122_v21 = vld [vmem:[%s3800_s1 + $0x2c8] sm:$0xff] }
  0x1d   :  { %241 = vmatpush1.msra.mxu0 %v39_v47  ;;  %321 = vmatprep.subr.mxu1 %v139_v58  ;;  %v106_v22 = vld [vmem:[%s3800_s1 + $0x248] sm:$0xff]  ;;  %v105_v24 = vld [vmem:[%s3800_s1 + $0x240] sm:$0xff]  ;;  %v119_v25 = vld [vmem:[%s3800_s1 + $0x2b0] sm:$0xff] }
  0x1e   :  { %242 = vmatprep.subr.mxu0 %v37_v49  ;;  %322 = vmatpush1.msra.mxu1 %v138_v60  ;;  %v74_v23 = vld [vmem:[%s3800_s1 + $0x148] sm:$0xff]  ;;  %v103_v26 = vld [vmem:[%s3800_s1 + $0x230] sm:$0xff]  ;;  %v100_v30 = vld [vmem:[%s3800_s1 + $0x218] sm:$0xff] }
  0x1f   :  { %243 = vmatpush1.msra.mxu0 %v36_v51  ;;  %323 = vmatprep.subr.mxu1 %v136_v62  ;;  %v2698_v27 = vld [vmem:[%s3799_s0 + $0x8] sm:$0xff]  ;;  %v71_v29 = vld [vmem:[%s3800_s1 + $0x130] sm:$0xff]  ;;  %v116_v31 = vld [vmem:[%s3800_s1 + $0x298] sm:$0xff] }
  0x20   :  { %244 = vmatprep.subr.mxu0 %v34_v53  ;;  %324 = vmatpush1.msra.mxu1 %v135_v0  ;;  %v102_v28 = vld [vmem:[%s3800_s1 + $0x228] sm:$0xff]  ;;  %v99_v32 = vld [vmem:[%s3800_s1 + $0x210] sm:$0xff]  ;;  %v68_v33 = vld [vmem:[%s3800_s1 + $0x118] sm:$0xff] }
  0x21   :  { %245 = vmatpush1.msra.mxu0 %v33_v55  ;;  %325 = vmatprep.subr.mxu1 %v133_v2  ;;  %v97_v34 = vld [vmem:[%s3800_s1 + $0x200] sm:$0xff]  ;;  %v96_v36 = vld [vmem:[%s3800_s1 + $0x1f8] sm:$0xff] }
  0x22   :  { %246 = vmatprep.subr.mxu0 %v127_v57  ;;  %326 = vmatpush1.msra.mxu1 %v132_v5  ;;  %v113_v35 = vld [vmem:[%s3800_s1 + $0x280] sm:$0xff] }
  0x23   :  { %247 = vmatpush2.msra.mxu0 %v126_v59  ;;  %327 = vmatprep.subr.mxu1 %v130_v7  ;;  %v65_v37 = vld [vmem:[%s3800_s1 + $0x100] sm:$0xff] }
  0x24   :  { %248 = vmatprep.subr.mxu0 %v124_v61  ;;  %328 = vmatpush1.msra.mxu1 %v129_v9 }
  0x25   :  { %249 = vmatpush2.msra.mxu0 %v123_v63  ;;  %2024 = vmatprep.subr.mxu1 %v128_v11 }
  0x26   :  { %250 = vmatprep.subr.mxu0 %v121_v1  ;;  %2006 = vmatmul.mubr.msk.f32.vlgmr.msra.gmra.mxu1 %vm194_vm1, %v2652_v13 }
  0x27   :  { %251 = vmatpush2.msra.mxu0 %v120_v3  ;;  %2025 = vmatpush3.msra.mxu1 %v80_v15 }
  0x28   :  { %252 = vmatprep.subr.mxu0 %v118_v6  ;;  %2026 = vmatprep.subr.mxu1 %v125_v17 }
  0x29   :  { %253 = vmatpush2.msra.mxu0 %v117_v8  ;;  %2027 = vmatpush3.msra.mxu1 %v77_v19 }
  0x2a   :  { %254 = vmatprep.subr.mxu0 %v115_v10  ;;  %2028 = vmatprep.subr.mxu1 %v122_v21 }
  0x2b   :  { %255 = vmatpush2.msra.mxu0 %v114_v12  ;;  %2029 = vmatpush3.msra.mxu1 %v74_v23 }
  0x2c   :  { %256 = vmatprep.subr.mxu0 %v112_v14  ;;  %2030 = vmatprep.subr.mxu1 %v119_v25 }
  0x2d   :  { %257 = vmatpush2.msra.mxu0 %v111_v16  ;;  %278 = vmatprep.mubr.f32.mxu0 %v2698_v27 }
  0x2e   :  { %258 = vmatprep.subr.mxu0 %v109_v18  ;;  %2031 = vmatpush3.msra.mxu1 %v71_v29 }
  0x2f   :  { %259 = vmatpush2.msra.mxu0 %v108_v20  ;;  %2032 = vmatprep.subr.mxu1 %v116_v31 }
  0x30   :  { %260 = vmatprep.subr.mxu0 %v106_v22 }
  0x31   :  { %261 = vmatpush2.msra.mxu0 %v105_v24 }
  0x32   :  { %262 = vmatprep.subr.mxu0 %v103_v26 }
  0x33   :  { %263 = vmatpush2.msra.mxu0 %v102_v28 }
  0x34   :  { %264 = vmatprep.subr.mxu0 %v100_v30 }
  0x35   :  { %11 = vsyncpa [#allocation3], 0  ;;  %265 = vmatpush2.msra.mxu0 %v99_v32  ;;  %v94_v38 = vld [vmem:[%s3800_s1 + $0x1e8] sm:$0xff]  ;;  %2033 = vmatpush3.msra.mxu1 %v68_v33  ;;  %v93_v40 = vld [vmem:[%s3800_s1 + $0x1e0] sm:$0xff]  ;;  %vm2380_vm2 = vmmov 0   ;;  %v179_v29 = vlaneseq  ;;  %s2382_s14 = smov 96  }
  0x36   :  { %v110_v39 = vld [vmem:[%s3800_s1 + $0x268] sm:$0xff]  ;;  %266 = vmatprep.subr.mxu0 %v97_v34  ;;  %2034 = vmatprep.subr.mxu1 %v113_v35  ;;  %v91_v41 = vld [vmem:[%s3800_s1 + $0x1d0] sm:$0xff]  ;;  %v88_v45 = vld [vmem:[%s3800_s1 + $0x1b8] sm:$0xff]  ;;  %s2383_s15 = smov 32   ;;  %vm705_vm3 = vcmask 261120   ;;  %vm707_vm4 = vcmask 523264  }
  0x37   :  { %267 = vmatpush2.msra.mxu0 %v96_v36  ;;  %2035 = vmatpush3.msra.mxu1 %v65_v37  ;;  %v62_v42 = vld [vmem:[%s3800_s1 + $0xe8] sm:$0xff]  ;;  %v107_v46 = vld [vmem:[%s3800_s1 + $0x250] sm:$0xff]  ;;  %v85_v49 = vld [vmem:[%s3800_s1 + $0x1a0] sm:$0xff]  ;;  %v2950_v31 = vshrl.u32 %v179_v29, 7  ;;  %vm709_vm5 = vcmask 785408   ;;  %vm1469_vm6 = vcmask 1041409  }
  0x38   :  { %268 = vmatprep.subr.mxu0 %v94_v38  ;;  %v90_v43 = vld [vmem:[%s3800_s1 + $0x1c8] sm:$0xff]  ;;  %2036 = vmatprep.subr.mxu1 %v110_v39  ;;  %v87_v47 = vld [vmem:[%s3800_s1 + $0x1b0] sm:$0xff]  ;;  %v104_v50 = vld [vmem:[%s3800_s1 + $0x238] sm:$0xff]  ;;  %vm1988_vm7 = vcmask 123904  }
  0x39   :  { %v2752_v44 = vld [vmem:[%s3799_s0 + $0x28] sm:$0xff]  ;;  %269 = vmatpush2.msra.mxu0 %v93_v40  ;;  %367 = vmatprep.mubr.f32.mxu1 %v2379_v4  ;;  %v59_v48 = vld [vmem:[%s3800_s1 + $0xd0] sm:$0xff]  ;;  %v84_v51 = vld [vmem:[%s3800_s1 + $0x198] sm:$0xff]  ;;  %v2953_v33 = vsub.s32 0, %v2950_v31  ;;  %v185_v34 = vsub.s32 1, %v2950_v31 }
  0x3a   :  { %270 = vmatprep.subr.mxu0 %v91_v41  ;;  %2037 = vmatpush3.msra.mxu1 %v62_v42  ;;  %v82_v52 = vld [vmem:[%s3800_s1 + $0x188] sm:$0xff]  ;;  %v56_v53 = vld [vmem:[%s3800_s1 + $0xb8] sm:$0xff]  ;;  %v81_v54 = vld [vmem:[%s3800_s1 + $0x180] sm:$0xff] }
  0x3b   :  { %271 = vmatpush2.msra.mxu0 %v90_v43  ;;  %2007 = vmatmul.mubr.msk.f32.gmra.mxu1 %vm194_vm1, %v2752_v44  ;;  %v2790_v55 = vld [vmem:[%s3799_s0 + $0x40] sm:$0xff]  ;;  %v176_v57 = vld [vmem:[%s3800_s1 + $0x478] sm:$0x3]  ;;  %v170_v63 = vld [vmem:[%s3800_s1 + $0x448] sm:$0xff] }
  0x3c   :  { %272 = vmatprep.subr.mxu0 %v88_v45  ;;  %2038 = vmatprep.subr.mxu1 %v107_v46  ;;  %v2795_v56 = vld [vmem:[%s3799_s0] sm:$0xff]  ;;  %v2824_v62 = vld [vmem:[%s3799_s0 + $0x18] sm:$0xff]  ;;  %v98_v1 = vld [vmem:[%s3800_s1 + $0x208] sm:$0xff] }
  0x3d   :  { %273 = vmatpush2.msra.mxu0 %v87_v47  ;;  %2039 = vmatpush3.msra.mxu1 %v59_v48  ;;  %v2804_v58 = vld [vmem:[%s3799_s0 + $0x20] sm:$0xff]  ;;  %v2833_v0 = vld [vmem:[%s3799_s0 + $0x38] sm:$0xff]  ;;  %v167_v2 = vld [vmem:[%s3800_s1 + $0x430] sm:$0xff] }
  0x3e   :  { %274 = vmatprep.subr.mxu0 %v85_v49  ;;  %2040 = vmatprep.subr.mxu1 %v104_v50  ;;  %v101_v59 = vld [vmem:[%s3800_s1 + $0x220] sm:$0xff]  ;;  %v50_v3 = vld [vmem:[%s3800_s1 + $0x88] sm:$0xff]  ;;  %v2850_v5 = vld [vmem:[%s3799_s0 + $0x30] sm:$0xff] }
  0x3f   :  { %275 = vmatpush2.msra.mxu0 %v84_v51  ;;  %373 = vmatprep.mubr.f32.mxu1 %v2379_v4  ;;  %v173_v60 = vld [vmem:[%s3800_s1 + $0x460] sm:$0xff]  ;;  %v164_v6 = vld [vmem:[%s3800_s1 + $0x418] sm:$0xff]  ;;  %v95_v7 = vld [vmem:[%s3800_s1 + $0x1f0] sm:$0xff] }
  0x40   :  { %276 = vmatprep.subr.mxu0 %v82_v52  ;;  %2041 = vmatpush3.msra.mxu1 %v56_v53  ;;  %v53_v61 = vld [vmem:[%s3800_s1 + $0xa0] sm:$0xff]  ;;  %v47_v8 = vld [vmem:[%s3800_s1 + $0x70] sm:$0xff]  ;;  %v92_v10 = vld [vmem:[%s3800_s1 + $0x1d8] sm:$0xff] }
  0x41   :  { %277 = vmatpush2.msra.mxu0 %v81_v54  ;;  %2008 = vmatmul.mubr.msk.f32.gmra.mxu1 %vm194_vm1, %v2790_v55  ;;  %v161_v9 = vld [vmem:[%s3800_s1 + $0x400] sm:$0xff]  ;;  %v44_v11 = vld [vmem:[%s3800_s1 + $0x58] sm:$0xff]  ;;  %v158_v12 = vld [vmem:[%s3800_s1 + $0x3e8] sm:$0xff] }
  0x42   :  { %279 = vmatmul.mubr.f32.vlgmr.msra.gmra.mxu0 %v2795_v56  ;;  %2194 = vmatprep.subr.mxu0 %v2379_v4  ;;  %v89_v14 = vld [vmem:[%s3800_s1 + $0x1c0] sm:$0xff]  ;;  %v155_v16 = vld [vmem:[%s3800_s1 + $0x3d0] sm:$0xff]  ;;  %v86_v17 = vld [vmem:[%s3800_s1 + $0x1a8] sm:$0xff] }
  0x43   :  { %2195 = vmatpush3.msk.msra.mxu0 %vm204_vm0, %v176_v57  ;;  %284 = vmatprep.mubr.f32.mxu0 %v2804_v58  ;;  %v41_v15 = vld [vmem:[%s3800_s1 + $0x40] sm:$0xff]  ;;  %v38_v18 = vld [vmem:[%s3800_s1 + $0x28] sm:$0xff]  ;;  %v152_v19 = vld [vmem:[%s3800_s1 + $0x3b8] sm:$0xff] }
  0x44   :  { %2196 = vmatprep.subr.mxu0 %v2379_v4  ;;  %2042 = vmatprep.subr.mxu1 %v101_v59  ;;  %v83_v20 = vld [vmem:[%s3800_s1 + $0x190] sm:$0xff]  ;;  %v149_v22 = vld [vmem:[%s3800_s1 + $0x3a0] sm:$0xff]  ;;  %v146_v23 = vld [vmem:[%s3800_s1 + $0x388] sm:$0xff] }
  0x45   :  { %2197 = vmatpush3.msra.mxu0 %v173_v60  ;;  %2043 = vmatpush3.msra.mxu1 %v53_v61  ;;  %v35_v21 = vld [vmem:[%s3800_s1 + $0x10] sm:$0xff]  ;;  %v140_v25 = vld [vmem:[%s3800_s1 + $0x358] sm:$0xff]  ;;  %v137_v26 = vld [vmem:[%s3800_s1 + $0x340] sm:$0xff] }
  0x46   :  { %285 = vmatmul.mubr.f32.gmra.mxu0 %v2824_v62  ;;  %2198 = vmatprep.subr.mxu0 %v2379_v4  ;;  %v143_v24 = vld [vmem:[%s3800_s1 + $0x370] sm:$0xff] }
  0x47   :  { %2199 = vmatpush3.msra.mxu0 %v170_v63  ;;  %290 = vmatprep.mubr.f32.mxu0 %v2833_v0  ;;  %v131_v28 = vld [vmem:[%s3800_s1 + $0x310] sm:$0xff] }
  0x48   :  { %2200 = vmatprep.subr.mxu0 %v2379_v4  ;;  %2044 = vmatprep.subr.mxu1 %v98_v1 }
  0x49   :  { %2201 = vmatpush3.msra.mxu0 %v167_v2  ;;  %2045 = vmatpush3.msra.mxu1 %v50_v3 }
  0x4a   :  { %291 = vmatmul.mubr.f32.gmra.mxu0 %v2850_v5  ;;  %2202 = vmatprep.subr.mxu0 %v2379_v4 }
  0x4b   :  { %2203 = vmatpush3.msra.mxu0 %v164_v6  ;;  %2046 = vmatprep.subr.mxu1 %v95_v7 }
  0x4c   :  { %2204 = vmatprep.subr.mxu0 %v2379_v4  ;;  %2047 = vmatpush3.msra.mxu1 %v47_v8 }
  0x4d   :  { %2205 = vmatpush3.msra.mxu0 %v161_v9  ;;  %2048 = vmatprep.subr.mxu1 %v92_v10 }
  0x4e   :  { %2206 = vmatprep.subr.mxu0 %v2379_v4  ;;  %2049 = vmatpush3.msra.mxu1 %v44_v11 }
  0x4f   :  { %2207 = vmatpush3.msra.mxu0 %v158_v12  ;;  %2050 = vmatprep.subr.mxu1 %v89_v14 }
  0x50   :  { %2208 = vmatprep.subr.mxu0 %v2379_v4  ;;  %2051 = vmatpush3.msra.mxu1 %v41_v15 }
  0x51   :  { %2209 = vmatpush3.msra.mxu0 %v155_v16  ;;  %2052 = vmatprep.subr.mxu1 %v86_v17 }
  0x52   :  { %2210 = vmatprep.subr.mxu0 %v2379_v4  ;;  %2053 = vmatpush3.msra.mxu1 %v38_v18 }
  0x53   :  { %2211 = vmatpush3.msra.mxu0 %v152_v19  ;;  %2054 = vmatprep.subr.mxu1 %v83_v20 }
  0x54   :  { %2212 = vmatprep.subr.mxu0 %v2379_v4  ;;  %2055 = vmatpush3.msra.mxu1 %v35_v21 }
  0x55   :  { %2213 = vmatpush3.msra.mxu0 %v149_v22  ;;  %444 = vmatprep.mubr.f32.mxu1 %v2698_v27  ;;  %v134_v27 = vld [vmem:[%s3800_s1 + $0x328] sm:$0xff] }
  0x56   :  { %2214 = vmatprep.subr.mxu0 %v2379_v4  ;;  %445 = vmatmul.mubr.f32.vlgmr.msra.gmra.mxu1 %v2795_v56 }
  0x57   :  { %2215 = vmatpush3.msra.mxu0 %v146_v23  ;;  %449 = vmatprep.mubr.f32.mxu1 %v2804_v58 }
  0x58   :  { %2216 = vmatprep.subr.mxu0 %v2379_v4  ;;  %2226 = vmatprep.mubr.msk.f32.mxu0 %vm2380_vm2, %v2379_v4 }
  0x59   :  { %2217 = vmatpush3.msra.mxu0 %v143_v24 }
  0x5a   :  { %2218 = vmatprep.subr.mxu0 %v2379_v4  ;;  %450 = vmatmul.mubr.f32.gmra.mxu1 %v2824_v62 }
  0x5b   :  { %2219 = vmatpush3.msra.mxu0 %v140_v25  ;;  %454 = vmatprep.mubr.f32.mxu1 %v2833_v0 }
  0x5c   :  { %2220 = vmatprep.subr.mxu0 %v2379_v4 }
  0x5d   :  { %2221 = vmatpush3.msra.mxu0 %v137_v26 }
  0x5e   :  { %2222 = vmatprep.subr.mxu0 %v2379_v4  ;;  %455 = vmatmul.mubr.f32.gmra.mxu1 %v2850_v5 }
  0x5f   :  { %2223 = vmatpush3.msra.mxu0 %v134_v27 }
  0x60   :  { %2224 = vmatprep.subr.mxu0 %v2379_v4 }
  0x61   :  { %2225 = vmatpush3.msra.mxu0 %v131_v28 }
  0x62   :  { %2227 = vmatmul.mubr.msk.f32.vlgmr.msra.gmra.mxu0 %vm194_vm1, %v2652_v13  ;;  %v2958_v13 = vld [vmem:[%s3801_s2] sm:$0x7]  ;;  %s2381_s2 = smov 64  }
  0x63   :  { %2229 = vmatprep.mubr.msk.f32.mxu0 %vm2380_vm2, %v2379_v4  ;;  %v182_v36 = vrot.slane %v2958_v13, %v2953_v33  ;;  %v186_v38 = vrot.slane %v2958_v13, %v185_v34  ;;  %v189_v34 = vsub.s32 2, %v2950_v31 }
  0x66   :  { %2230 = vmatmul.mubr.msk.f32.gmra.mxu0 %vm194_vm1, %v2752_v44 }
  0x67   :  { %2232 = vmatprep.mubr.msk.f32.mxu0 %vm2380_vm2, %v2379_v4 }
  0x6a   :  { %2233 = vmatmul.mubr.msk.f32.gmra.mxu0 %vm194_vm1, %v2790_v55 }
  0xe6   :  { %v363_v30 = vpop.f32.mrf.mxu1 }
  0xe8   :  { %v365_v32 = vpop.f32.mrf.mxu1 }
  0xfb   :  { %v369_v35 = vpop.f32.mrf.mxu1 }
  0xfd   :  { %v371_v40 = vpop.f32.mrf.mxu1 }
 0x101   :  { %v375_v46 = vpop.f32.mrf.mxu1 }
 0x102   :  { %v280_v37 = vpop.f32.mrf.mxu0 }
 0x103   :  { %v281_v41 = vadd.f32 %v280_v37, %v182_v36  ;;  %v377_v56 = vpop.f32.mrf.mxu1 }
 0x104   :  { %v282_v39 = vpop.f32.mrf.mxu0 }
 0x105   :  { %v283_v43 = vadd.f32 %v282_v39, %v186_v38  ;;  %v2966_v49 = vadd.f32 %v363_v30, %v281_v41  ;;  %v190_v41 = vrot.slane %v2958_v13, %v189_v34 }
 0x106   :  { %v286_v42 = vpop.f32.mrf.mxu0 }
 0x107   :  { %v287_v44 = vadd.f32 %v286_v42, %v182_v36  ;;  %v2968_v51 = vadd.f32 %v365_v32, %v283_v43  ;;  %v540_v59 = vmul.f32 %v2966_v49, %v2966_v49 }
 0x108   :  { %v288_v45 = vpop.f32.mrf.mxu0 }
 0x109   :  { %v289_v47 = vadd.f32 %v288_v45, %v186_v38  ;;  %v2964_v48 = vadd.f32 %v369_v35, %v287_v44  ;;  %v541_v62 = vmul.f32 %v2968_v51, %v2968_v51 }
 0x10a   :  { %v292_v50 = vpop.f32.mrf.mxu0 }
 0x10b   :  { %v293_v52 = vadd.f32 %v292_v50, %v182_v36  ;;  %v2970_v53 = vadd.f32 %v371_v40, %v289_v47  ;;  %v543_v54 = vmul.f32 %v2964_v48, %v2964_v48  ;;  %v549_v60 = vadd.f32 %v2964_v48, %v2966_v49 }
 0x10c   :  { %v294_v55 = vpop.f32.mrf.mxu0 }
 0x10d   :  { %v544_v57 = vmul.f32 %v2970_v53, %v2970_v53  ;;  %v295_v58 = vadd.f32 %v294_v55, %v186_v38  ;;  %v2980_v61 = vadd.f32 %v375_v46, %v293_v52  ;;  %v557_v63 = vadd.f32 %v2970_v53, %v2968_v51 }
 0x10e   :  { %v573_v1 = vadd.f32 %v543_v54, %v540_v59 }
 0x10f   :  { %v2986_v0 = vadd.f32 %v377_v56, %v295_v58  ;;  %v546_v2 = vmul.f32 %v2980_v61, %v2980_v61  ;;  %v550_v3 = vadd.f32 %v549_v60, %v2980_v61  ;;  %v581_v5 = vadd.f32 %v544_v57, %v541_v62 }
 0x111   :  { %v547_v6 = vmul.f32 %v2986_v0, %v2986_v0  ;;  %v558_v7 = vadd.f32 %v557_v63, %v2986_v0  ;;  %v551_v8 = vrot.slane %v550_v3, 4  ;;  %v574_v9 = vadd.f32 %v573_v1, %v546_v2 }
 0x113   :  { %v582_v10 = vadd.f32 %v581_v5, %v547_v6  ;;  %v552_v11 = vadd.f32 %v551_v8, %v550_v3  ;;  %v575_v12 = vrot.slane %v574_v9, 4  ;;  %v559_v14 = vrot.slane %v558_v7, 4 }
 0x115   :  { %v583_v15 = vrot.slane %v582_v10, 4  ;;  %v553_v16 = vrot.slane %v552_v11, 2  ;;  %v576_v17 = vadd.f32 %v575_v12, %v574_v9  ;;  %v560_v21 = vadd.f32 %v559_v14, %v558_v7 }
 0x116   :  { %v2056_v18 = vpop.f32.mrf.mxu1 }
 0x117   :  { %v554_v19 = vadd.f32 %v553_v16, %v552_v11  ;;  %v577_v20 = vrot.slane %v576_v17, 2  ;;  %v584_v22 = vadd.f32 %v583_v15, %v582_v10  ;;  %v561_v27 = vrot.slane %v560_v21, 2 }
 0x118   :  { %v2057_v23 = vpop.f32.mrf.mxu1 }
 0x119   :  { %v555_v24 = vrot.slane %v554_v19, 1  ;;  %v578_v26 = vadd.f32 %v577_v20, %v576_v17  ;;  %v585_v28 = vrot.slane %v584_v22, 2  ;;  %v562_v36 = vadd.f32 %v561_v27, %v560_v21 }
 0x11a   :  { %v2059_v25 = vpop.f32.mrf.mxu1  ;;  %v2058_v39 = vadd.f32 %v2057_v23, %v2056_v18 }
 0x11b   :  { %v2994_v29 = vadd.f32 %v555_v24, %v554_v19  ;;  %v579_v32 = vrot.slane %v578_v26, 1  ;;  %v586_v38 = vadd.f32 %v585_v28, %v584_v22  ;;  %v563_v46 = vrot.slane %v562_v36, 1 }
 0x11c   :  { %v2060_v30 = vpop.f32.mrf.mxu1  ;;  %v447_v47 = vadd.f32 %v2058_v39, %v190_v41 }
 0x11d   :  { %607 = vrot.lane.b32.xlu1 %v2994_v29, %s2381_s2  ;;  %598 = vrot.lane.b32.xlu0 %v2994_v29, %s2382_s14  ;;  %v3001_v37 = vadd.f32 %v579_v32, %v578_v26  ;;  %v2061_v40 = vadd.f32 %v2060_v30, %v2059_v25  ;;  %v587_v45 = vrot.slane %v586_v38, 1  ;;  %v564_v58 = vadd.f32 %v563_v46, %v562_v36 }
 0x11e   :  { %v2062_v35 = vpop.f32.mrf.mxu1 }
 0x11f   :  { %v452_v52 = vadd.f32 %v2061_v40, %v190_v41  ;;  %v588_v57 = vadd.f32 %v587_v45, %v586_v38 }
 0x120   :  { %v2063_v43 = vpop.f32.mrf.mxu1 }
 0x121   :  { %615 = vrot.lane.b32.xlu0 %v2994_v29, %s2383_s15  ;;  %611 = vrot.lane.b32.xlu1 %v3001_v37, %s2381_s2  ;;  %v2064_v50 = vadd.f32 %v2063_v43, %v2062_v35 }
 0x122   :  { %v526_v42 = vpop.f32.mrf.mxu0 }
 0x123   :  { %v3012_v54 = vadd.f32 %v526_v42, %v447_v47  ;;  %v457_v60 = vadd.f32 %v2064_v50, %v190_v41 }
 0x124   :  { %v2228_v44 = vpop.f32.mrf.mxu0 }
 0x125   :  { %619 = vrot.lane.b32.xlu1 %v3001_v37, %s2383_s15  ;;  %603 = vrot.lane.b32.xlu0 %v3001_v37, %s2382_s14  ;;  %v542_v63 = vmul.f32 %v3012_v54, %v3012_v54 }
 0x126   :  { %v531_v13 = vpop.f32.mrf.mxu0 }
 0x127   :  { %v3014_v55 = vadd.f32 %v531_v13, %v452_v52 }
 0x128   :  { %v2231_v56 = vpop.f32.mrf.mxu0 }
 0x129   :  { %v545_v59 = vmul.f32 %v3014_v55, %v3014_v55  ;;  %631 = vrot.lane.b32.xlu1 %v588_v57, %s2382_s14  ;;  %626 = vrot.lane.b32.xlu0 %v564_v58, %s2382_s14  ;;  %v565_v1 = vadd.f32 %v3014_v55, %v3012_v54 }
 0x12a   :  { %v536_v62 = vpop.f32.mrf.mxu0 }
 0x12b   :  { %v3024_v2 = vadd.f32 %v536_v62, %v457_v60  ;;  %v589_v5 = vadd.f32 %v545_v59, %v542_v63 }
 0x12c   :  { %v2234_v3 = vpop.f32.mrf.mxu0 }
 0x12d   :  { %v548_v6 = vmul.f32 %v3024_v2, %v3024_v2  ;;  %v566_v7 = vadd.f32 %v565_v1, %v3024_v2  ;;  %639 = vrot.lane.b32.xlu1 %v588_v57, %s2381_s2  ;;  %635 = vrot.lane.b32.xlu0 %v564_v58, %s2381_s2 }
 0x12f   :  { %v567_v8 = vrot.slane %v566_v7, 4  ;;  %v590_v9 = vadd.f32 %v589_v5, %v548_v6 }
 0x131   :  { %v568_v10 = vadd.f32 %v567_v8, %v566_v7  ;;  %v591_v11 = vrot.slane %v590_v9, 4  ;;  %647 = vrot.lane.b32.xlu1 %v588_v57, %s2383_s15  ;;  %643 = vrot.lane.b32.xlu0 %v564_v58, %s2383_s15 }
 0x133   :  { %v569_v12 = vrot.slane %v568_v10, 2  ;;  %v592_v14 = vadd.f32 %v591_v11, %v590_v9 }
 0x135   :  { %v570_v15 = vadd.f32 %v569_v12, %v568_v10  ;;  %v593_v16 = vrot.slane %v592_v14, 2 }
 0x137   :  { %v571_v17 = vrot.slane %v570_v15, 1  ;;  %v594_v18 = vadd.f32 %v593_v16, %v592_v14  ;;  %v684_v16 = vld [vmem:[%s3802_s3] sm:$0x1] }
 0x139   :  { %v572_v19 = vadd.f32 %v571_v17, %v570_v15  ;;  %v595_v20 = vrot.slane %v594_v18, 1 }
 0x13b   :  { %654 = vrot.lane.b32.xlu0 %v572_v19, %s2382_s14  ;;  %v596_v21 = vadd.f32 %v595_v20, %v594_v18 }
 0x13d   :  { %659 = vrot.lane.b32.xlu1 %v596_v21, %s2382_s14 }
 0x13f   :  { %663 = vrot.lane.b32.xlu0 %v572_v19, %s2381_s2 }
 0x141   :  { %667 = vrot.lane.b32.xlu1 %v596_v21, %s2381_s2 }
 0x143   :  { %671 = vrot.lane.b32.xlu0 %v572_v19, %s2383_s15 }
 0x145   :  { %675 = vrot.lane.b32.xlu1 %v596_v21, %s2383_s15 }
 0x18f   :  { %v608_v22 = vpop.permute.xlu1 %607  ;;  %v599_v23 = vpop.permute.xlu0 %598 }
 0x190   :  { %v601_v30 = vadd.f32 %v599_v23, %v2994_v29 }
 0x192   :  { %v610_v35 = vadd.f32 %v608_v22, %v601_v30 }
 0x193   :  { %v616_v24 = vpop.permute.xlu0 %615  ;;  %v612_v25 = vpop.permute.xlu1 %611 }
 0x194   :  { %v618_v39 = vadd.f32 %v616_v24, %v610_v35 }
 0x196   :  { %v623_v44 = vadd.f32 %v618_v39, %v564_v58 }
 0x197   :  { %v604_v26 = vpop.permute.xlu0 %603  ;;  %v620_v27 = vpop.permute.xlu1 %619 }
 0x198   :  { %v606_v28 = vadd.f32 %v604_v26, %v3001_v37 }
 0x19a   :  { %v614_v32 = vadd.f32 %v612_v25, %v606_v28 }
 0x19b   :  { %v627_v34 = vpop.permute.xlu0 %626  ;;  %v632_v38 = vpop.permute.xlu1 %631 }
 0x19c   :  { %v622_v36 = vadd.f32 %v620_v27, %v614_v32  ;;  %v629_v45 = vadd.f32 %v627_v34, %v623_v44  ;;  %v2384_v27 = vmov 1983009808  }
 0x19d   :  { %v767_v28 = vunpack.c.l.s4 %v2384_v27 }
 0x19e   :  { %v624_v40 = vadd.f32 %v622_v36, %v588_v57 }
 0x19f   :  { %v636_v41 = vpop.permute.xlu0 %635  ;;  %v640_v42 = vpop.permute.xlu1 %639  ;;  %v768_v36 = vunpack.c.0.s8 %v767_v28 }
 0x1a0   :  { %v634_v43 = vadd.f32 %v632_v38, %v624_v40  ;;  %v638_v50 = vadd.f32 %v636_v41, %v629_v45 }
 0x1a2   :  { %v642_v47 = vadd.f32 %v640_v42, %v634_v43  ;;  %v3062_v43 = vsub.s32 %v768_v36, %v2950_v31 }
 0x1a3   :  { %v644_v46 = vpop.permute.xlu0 %643  ;;  %v648_v52 = vpop.permute.xlu1 %647 }
 0x1a4   :  { %v646_v13 = vadd.f32 %v644_v46, %v638_v50  ;;  %v650_v56 = vadd.f32 %v648_v52, %v642_v47 }
 0x1a6   :  { %v651_v59 = vadd.f32 %v646_v13, %v572_v19  ;;  %v652_v63 = vadd.f32 %v650_v56, %v596_v21  ;;  %v688_v19 = vld [vmem:[%s3803_s4] sm:$0x1] }
 0x1ad   :  { %v655_v37 = vpop.permute.xlu0 %654 }
 0x1ae   :  { %v657_v62 = vadd.f32 %v655_v37, %v651_v59 }
 0x1af   :  { %v660_v29 = vpop.permute.xlu1 %659 }
 0x1b0   :  { %v662_v3 = vadd.f32 %v660_v29, %v652_v63 }
 0x1b1   :  { %v664_v60 = vpop.permute.xlu0 %663 }
 0x1b2   :  { %v666_v57 = vadd.f32 %v664_v60, %v657_v62 }
 0x1b3   :  { %v668_v1 = vpop.permute.xlu1 %667 }
 0x1b4   :  { %v670_v6 = vadd.f32 %v668_v1, %v662_v3 }
 0x1b5   :  { %v672_v5 = vpop.permute.xlu0 %671 }
 0x1b6   :  { %v674_v7 = vadd.f32 %v672_v5, %v666_v57 }
 0x1b7   :  { %v676_v58 = vpop.permute.xlu1 %675 }
 0x1b8   :  { %v679_v8 = vmul.f32 0.0034722222, %v674_v7  ;;  %v678_v9 = vadd.f32 %v676_v58, %v670_v6 }
 0x1ba   :  { %v681_v10 = vmul.f32 %v679_v8, %v679_v8  ;;  %v680_v11 = vmul.f32 0.0034722222, %v678_v9 }
 0x1bc   :  { %v682_v12 = vsub.f32 %v680_v11, %v681_v10 }
 0x1be   :  { %v683_v14 = vmax.f32 %v682_v12, 0.0 }
 0x1c0   :  { %v685_v15 = vadd.f32 1e-05, %v683_v14 }
 0x1c2   :  { %2353 = vrsqrt.f32 %v685_v15 }
 0x1cf   :  { %v2354_v17 = vpop.eup %2353 }
 0x1d0   :  { %v687_v18 = vmul.f32 %v2354_v17, %v684_v16 }
 0x1d2   :  { %v695_v20 = vrot.slane %v687_v18, %v2953_v33  ;;  %v689_v21 = vmul.f32 %v687_v18, %v679_v8 }
 0x1d4   :  { %699 = vrot.lane.b32.xlu1 %v695_v20, %s2381_s2  ;;  %696 = vrot.lane.b32.xlu0 %v695_v20, %s2383_s15  ;;  %v690_v22 = vsub.f32 %v688_v19, %v689_v21 }
 0x1d6   :  { %v715_v23 = vrot.slane %v690_v22, %v2953_v33 }
 0x1d8   :  { %702 = vrot.lane.b32.xlu0 %v695_v20, %s2382_s14  ;;  %716 = vrot.lane.b32.xlu1 %v715_v23, %s2383_s15 }
 0x1dc   :  { %719 = vrot.lane.b32.xlu0 %v715_v23, %s2381_s2  ;;  %722 = vrot.lane.b32.xlu1 %v715_v23, %s2382_s14 }
 0x246   :  { %v700_v24 = vpop.permute.xlu1 %699  ;;  %v697_v25 = vpop.permute.xlu0 %696 }
 0x247   :  { %v706_v26 = vsel %vm705_vm3, %v687_v18, %v697_v25 }
 0x248   :  { %v708_v30 = vsel %vm707_vm4, %v706_v26, %v700_v24 }
 0x24a   :  { %v703_v32 = vpop.permute.xlu0 %702  ;;  %v717_v34 = vpop.permute.xlu1 %716 }
 0x24b   :  { %v710_v35 = vsel %vm709_vm5, %v708_v30, %v703_v32  ;;  %v725_v39 = vsel %vm705_vm3, %v690_v22, %v717_v34 }
 0x24c   :  { %v731_v38 = vrot.slane %v710_v35, %v2953_v33 }
 0x24e   :  { %v720_v40 = vpop.permute.xlu0 %719  ;;  %v723_v41 = vpop.permute.xlu1 %722  ;;  %v737_v45 = vmul.f32 %v731_v38, %v3014_v55  ;;  %v735_v46 = vmul.f32 %v731_v38, %v2964_v48  ;;  %v736_v50 = vmul.f32 %v731_v38, %v2970_v53  ;;  %v732_v52 = vmul.f32 %v731_v38, %v2966_v49 }
 0x24f   :  { %v726_v42 = vsel %vm707_vm4, %v725_v39, %v720_v40  ;;  %v733_v13 = vmul.f32 %v731_v38, %v2968_v51  ;;  %v734_v37 = vmul.f32 %v731_v38, %v3012_v54  ;;  %v740_v56 = vmul.f32 %v731_v38, %v3024_v2 }
 0x250   :  { %v727_v44 = vsel %vm709_vm5, %v726_v42, %v723_v41  ;;  %v738_v31 = vmul.f32 %v731_v38, %v2980_v61  ;;  %v739_v29 = vmul.f32 %v731_v38, %v2986_v0 }
 0x251   :  { %v744_v47 = vrot.slane %v727_v44, %v2953_v33 }
 0x253   :  { %v3075_v59 = vadd.f32 %v744_v47, %v737_v45  ;;  %v3077_v55 = vadd.f32 %v744_v47, %v735_v46  ;;  %v3079_v48 = vadd.f32 %v744_v47, %v736_v50  ;;  %v3081_v33 = vadd.f32 %v744_v47, %v732_v52 }
 0x254   :  { %v3083_v53 = vadd.f32 %v744_v47, %v733_v13  ;;  %v3085_v49 = vadd.f32 %v744_v47, %v734_v37  ;;  %v753_v51 = vadd.f32 %v744_v47, %v740_v56  ;;  %v3087_v54 = vadd.f32 %v744_v47, %v738_v31 }
 0x255   :  { %v800_v61 = vcombine.high %v3075_v59, %v3075_v59  ;;  %v799_v0 = vcombine.high %v3077_v55, %v3079_v48  ;;  %v3093_v2 = vadd.f32 %v744_v47, %v739_v29  ;;  %v798_v60 = vcombine.low %v3077_v55, %v3079_v48 }
 0x256   :  { %v763_v62 = vcombine.low %v3081_v33, %v3083_v53  ;;  %v786_v63 = vrot.slane %v3085_v49, %v3062_v43  ;;  %v834_v1 = vcombine.high %v753_v51, %v753_v51  ;;  %v3102_v3 = vrot.slane %v753_v51, %v3062_v43 }
 0x257   :  { %v828_v57 = vrot.slane %v800_v61, %v3062_v43  ;;  %v814_v5 = vrot.slane %v799_v0, %v3062_v43  ;;  %v832_v6 = vcombine.low %v3087_v54, %v3093_v2  ;;  %v764_v7 = vcombine.high %v3081_v33, %v3083_v53 }
 0x258   :  { %v772_v58 = vrot.slane %v763_v62, %v3062_v43  ;;  %v2013_v8 = vcombine.low %v786_v63, %v786_v63  ;;  %v2014_v9 = vcombine.high %v786_v63, %v786_v63  ;;  %v3112_v10 = vrot.slane %v834_v1, %v3062_v43 }
 0x259   :  { %v2018_v11 = vcombine.low %v828_v57, %v828_v57  ;;  %v2019_v12 = vcombine.high %v828_v57, %v828_v57  ;;  %v831_v14 = vcombine.high %v814_v5, %v828_v57  ;;  %v830_v15 = vcombine.low %v814_v5, %v828_v57 }
 0x25a   :  { %v795_v16 = vcombine.high %v772_v58, %v786_v63  ;;  %v880_v17 = vrot.slane %v2013_v8, %v3062_v43  ;;  %v896_v18 = vrot.slane %v2014_v9, %v3062_v43  ;;  %v794_v19 = vcombine.low %v772_v58, %v786_v63 }
 0x25b   :  { %v960_v20 = vrot.slane %v2018_v11, %v3062_v43  ;;  %v976_v21 = vrot.slane %v2019_v12, %v3062_v43  ;;  %v969_v22 = vrot.slane %v831_v14, %v3062_v43  ;;  %v953_v23 = vrot.slane %v830_v15, %v3062_v43 }
 0x25c   :  { %v889_v24 = vrot.slane %v795_v16, %v3062_v43  ;;  %v3122_v25 = vsel %vm204_vm0, %v880_v17, -inf  ;;  %v3125_v26 = vsel %vm204_vm0, %v896_v18, -inf  ;;  %v3128_v27 = vrot.slane %v794_v19, %v3062_v43 }
 0x25d   :  { %v1175_v28 = vsel %vm204_vm0, %v960_v20, -inf  ;;  %v1196_v30 = vsel %vm204_vm0, %v976_v21, -inf  ;;  %v977_v32 = vcombine.high %v969_v22, %v969_v22  ;;  %v1182_v34 = vsel %vm204_vm0, %v969_v22, -inf }
 0x25e   :  { %v1176_v35 = vrot.slane %v1175_v28, 4  ;;  %v1197_v36 = vrot.slane %v1196_v30, 4  ;;  %v1183_v38 = vrot.slane %v1182_v34, 4  ;;  %v961_v39 = vcombine.high %v953_v23, %v953_v23 }
 0x25f   :  { %v1189_v40 = vsel %vm204_vm0, %v977_v32, -inf  ;;  %v1161_v41 = vsel %vm204_vm0, %v953_v23, -inf  ;;  %v897_v42 = vcombine.high %v889_v24, %v889_v24  ;;  %v1077_v44 = vsel %vm204_vm0, %v889_v24, -inf }
 0x260   :  { %v1177_v45 = vmax.f32 %v1175_v28, %v1176_v35  ;;  %v1198_v46 = vmax.f32 %v1196_v30, %v1197_v36  ;;  %v1184_v47 = vmax.f32 %v1182_v34, %v1183_v38  ;;  %v1190_v50 = vrot.slane %v1189_v40, 4 }
 0x261   :  { %v1162_v52 = vrot.slane %v1161_v41, 4  ;;  %v1168_v13 = vsel %vm204_vm0, %v961_v39, -inf  ;;  %v1078_v37 = vrot.slane %v1077_v44, 4  ;;  %v1084_v56 = vsel %vm204_vm0, %v897_v42, -inf }
 0x262   :  { %v1178_v31 = vrot.slane %v1177_v45, 2  ;;  %v1199_v29 = vrot.slane %v1198_v46, 2  ;;  %v1185_v51 = vrot.slane %v1184_v47, 2  ;;  %v1191_v61 = vmax.f32 %v1189_v40, %v1190_v50 }
 0x263   :  { %v1163_v0 = vmax.f32 %v1161_v41, %v1162_v52  ;;  %v1169_v62 = vrot.slane %v1168_v13, 4  ;;  %v1079_v63 = vmax.f32 %v1077_v44, %v1078_v37  ;;  %v1085_v1 = vrot.slane %v1084_v56, 4 }
 0x264   :  { %v1179_v57 = vmax.f32 %v1177_v45, %v1178_v31  ;;  %v1200_v5 = vmax.f32 %v1198_v46, %v1199_v29  ;;  %v1186_v58 = vmax.f32 %v1184_v47, %v1185_v51  ;;  %v1192_v8 = vrot.slane %v1191_v61, 2 }
 0x265   :  { %v1164_v9 = vrot.slane %v1163_v0, 2  ;;  %v1170_v11 = vmax.f32 %v1168_v13, %v1169_v62  ;;  %v1080_v12 = vrot.slane %v1079_v63, 2  ;;  %v1086_v14 = vmax.f32 %v1084_v56, %v1085_v1 }
 0x266   :  { %v1180_v15 = vrot.slane %v1179_v57, 1  ;;  %v1201_v16 = vrot.slane %v1200_v5, 1  ;;  %v1187_v17 = vrot.slane %v1186_v58, 1  ;;  %v1193_v18 = vmax.f32 %v1191_v61, %v1192_v8 }
 0x267   :  { %v1165_v19 = vmax.f32 %v1163_v0, %v1164_v9  ;;  %v1171_v20 = vrot.slane %v1170_v11, 2  ;;  %v1081_v21 = vmax.f32 %v1079_v63, %v1080_v12  ;;  %v1087_v22 = vrot.slane %v1086_v14, 2 }
 0x268   :  { %v3138_v23 = vmax.f32 %v1179_v57, %v1180_v15  ;;  %v3140_v24 = vmax.f32 %v1200_v5, %v1201_v16  ;;  %v3142_v28 = vmax.f32 %v1186_v58, %v1187_v17  ;;  %v1194_v30 = vrot.slane %v1193_v18, 1 }
 0x269   :  { %v1166_v32 = vrot.slane %v1165_v19, 1  ;;  %v1172_v34 = vmax.f32 %v1170_v11, %v1171_v20  ;;  %v1082_v35 = vrot.slane %v1081_v21, 1  ;;  %v1088_v36 = vmax.f32 %v1086_v14, %v1087_v22 }
 0x26a   :  { %v2253_v38 = vpack.i.bf16 %v3140_v24, %v3138_v23  ;;  %v3146_v39 = vmax.f32 %v1193_v18, %v1194_v30  ;;  %v1071_v40 = vrot.slane %v3122_v25, 4  ;;  %v1092_v41 = vrot.slane %v3125_v26, 4 }
 0x26b   :  { %v3150_v42 = vmax.f32 %v1165_v19, %v1166_v32  ;;  %v1173_v44 = vrot.slane %v1172_v34, 1  ;;  %v3152_v45 = vmax.f32 %v1081_v21, %v1082_v35  ;;  %v1089_v46 = vrot.slane %v1088_v36, 1 }
 0x26c   :  { %2254 = vrot.lane.b32.xlu1 %v2253_v38, %s2382_s14  ;;  %v2258_v47 = vpack.i.bf16 %v3146_v39, %v3142_v28  ;;  %v1072_v50 = vmax.f32 %v3122_v25, %v1071_v40  ;;  %v1093_v52 = vmax.f32 %v3125_v26, %v1092_v41  ;;  %v881_v13 = vcombine.high %v3128_v27, %v3128_v27 }
 0x26d   :  { %v3161_v37 = vmax.f32 %v1172_v34, %v1173_v44  ;;  %v3163_v56 = vmax.f32 %v1088_v36, %v1089_v46  ;;  %v1056_v31 = vsel %vm204_vm0, %v3128_v27, -inf  ;;  %v2022_v29 = vcombine.low %v3112_v10, %v3112_v10 }
 0x26e   :  { %2259 = vrot.lane.b32.xlu0 %v2258_v47, %s2382_s14  ;;  %v1073_v51 = vrot.slane %v1072_v50, 2  ;;  %v1094_v61 = vrot.slane %v1093_v52, 2  ;;  %v1057_v25 = vrot.slane %v1056_v31, 4  ;;  %v1063_v26 = vsel %vm204_vm0, %v881_v13, -inf }
 0x26f   :  { %v2263_v0 = vpack.i.bf16 %v3161_v37, %v3150_v42  ;;  %v2268_v62 = vpack.i.bf16 %v3163_v56, %v3152_v45  ;;  %v1064_v63 = vrot.slane %v1063_v26, 4  ;;  %v1024_v1 = vrot.slane %v2022_v29, %v3062_v43 }
 0x270   :  { %v1074_v27 = vmax.f32 %v1072_v50, %v1073_v51  ;;  %v1095_v57 = vmax.f32 %v1093_v52, %v1094_v61  ;;  %v1058_v5 = vmax.f32 %v1056_v31, %v1057_v25  ;;  %v841_v58 = vrot.slane %v832_v6, %v3062_v43 }
 0x271   :  { %2264 = vrot.lane.b32.xlu1 %v2263_v0, %s2382_s14  ;;  %v1065_v8 = vmax.f32 %v1063_v26, %v1064_v63  ;;  %v1259_v9 = vsel %vm204_vm0, %v1024_v1, -inf  ;;  %v765_v11 = vcombine.high %v3085_v49, %v3085_v49  ;;  %v779_v12 = vrot.slane %v764_v7, %v3062_v43 }
 0x272   :  { %2269 = vrot.lane.b32.xlu0 %v2268_v62, %s2382_s14  ;;  %v1075_v14 = vrot.slane %v1074_v27, 1  ;;  %v1096_v15 = vrot.slane %v1095_v57, 1  ;;  %v1059_v16 = vrot.slane %v1058_v5, 2  ;;  %v1260_v17 = vrot.slane %v1259_v9, 4 }
 0x273   :  { %v1066_v6 = vrot.slane %v1065_v8, 2  ;;  %v863_v18 = vcombine.low %v841_v58, %v3102_v3  ;;  %v864_v19 = vcombine.high %v841_v58, %v3102_v3  ;;  %v3192_v20 = vrot.slane %v765_v11, %v3062_v43 }
 0x274   :  { %v3194_v49 = vmax.f32 %v1074_v27, %v1075_v14  ;;  %v3196_v21 = vmax.f32 %v1095_v57, %v1096_v15  ;;  %v1060_v33 = vmax.f32 %v1058_v5, %v1059_v16  ;;  %v1261_v53 = vmax.f32 %v1259_v9, %v1260_v17 }
 0x275   :  { %v1067_v7 = vmax.f32 %v1065_v8, %v1066_v6  ;;  %v3199_v22 = vrot.slane %v863_v18, %v3062_v43  ;;  %v1001_v30 = vrot.slane %v864_v19, %v3062_v43  ;;  %v796_v32 = vcombine.low %v779_v12, %v3192_v20 }
 0x276   :  { %v2278_v34 = vpack.i.bf16 %v3196_v21, %v3194_v49  ;;  %v1061_v35 = vrot.slane %v1060_v33, 1  ;;  %v1262_v36 = vrot.slane %v1261_v53, 2  ;;  %v2015_v38 = vcombine.low %v3192_v20, %v3192_v20 }
 0x277   :  { %v1068_v40 = vrot.slane %v1067_v7, 1  ;;  %v1203_v41 = vsel %vm204_vm0, %v3199_v22, -inf  ;;  %v1224_v44 = vsel %vm204_vm0, %v1001_v30, -inf  ;;  %v905_v46 = vrot.slane %v796_v32, %v3062_v43 }
 0x278   :  { %2279 = vrot.lane.b32.xlu1 %v2278_v34, %s2382_s14  ;;  %v3212_v47 = vmax.f32 %v1060_v33, %v1061_v35  ;;  %v1263_v50 = vmax.f32 %v1261_v53, %v1262_v36  ;;  %v1204_v52 = vrot.slane %v1203_v41, 4  ;;  %v1225_v13 = vrot.slane %v1224_v44, 4 }
 0x279   :  { %v3214_v31 = vmax.f32 %v1067_v7, %v1068_v40  ;;  %v912_v29 = vrot.slane %v2015_v38, %v3062_v43  ;;  %v913_v51 = vcombine.high %v905_v46, %v905_v46  ;;  %v797_v61 = vcombine.high %v779_v12, %v3192_v20 }
 0x27a   :  { %v1264_v25 = vrot.slane %v1263_v50, 1  ;;  %v1205_v26 = vmax.f32 %v1203_v41, %v1204_v52  ;;  %v1226_v0 = vmax.f32 %v1224_v44, %v1225_v13  ;;  %v1098_v62 = vsel %vm204_vm0, %v905_v46, -inf }
 0x27b   :  { %v2273_v63 = vpack.i.bf16 %v3214_v31, %v3212_v47  ;;  %v1105_v1 = vsel %vm204_vm0, %v913_v51, -inf  ;;  %v1112_v27 = vsel %vm204_vm0, %v912_v29, -inf  ;;  %v3224_v57 = vrot.slane %v797_v61, %v3062_v43 }
 0x27c   :  { %v3226_v5 = vmax.f32 %v1263_v50, %v1264_v25  ;;  %v1206_v58 = vrot.slane %v1205_v26, 2  ;;  %v1227_v8 = vrot.slane %v1226_v0, 2  ;;  %v1106_v9 = vrot.slane %v1105_v1, 4 }
 0x27d   :  { %2274 = vrot.lane.b32.xlu0 %v2273_v63, %s2382_s14  ;;  %v1113_v11 = vrot.slane %v1112_v27, 4  ;;  %v1099_v12 = vrot.slane %v1098_v62, 4  ;;  %v1119_v14 = vsel %vm204_vm0, %v3224_v57, -inf  ;;  %v833_v15 = vcombine.high %v3087_v54, %v3093_v2 }
 0x27e   :  { %1354 = vrot.lane.b32.xlu1 %v3226_v5, %s2382_s14  ;;  %v1207_v16 = vmax.f32 %v1205_v26, %v1206_v58  ;;  %v1228_v17 = vmax.f32 %v1226_v0, %v1227_v8  ;;  %v1107_v6 = vmax.f32 %v1105_v1, %v1106_v9  ;;  %v1120_v18 = vrot.slane %v1119_v14, 4 }
 0x27f   :  { %v1114_v19 = vmax.f32 %v1112_v27, %v1113_v11  ;;  %v1100_v33 = vmax.f32 %v1098_v62, %v1099_v12  ;;  %v848_v53 = vrot.slane %v833_v15, %v3062_v43  ;;  %v1009_v7 = vcombine.high %v1001_v30, %v1001_v30 }
 0x280   :  { %v1208_v32 = vrot.slane %v1207_v16, 1  ;;  %v1229_v34 = vrot.slane %v1228_v17, 1  ;;  %v1108_v35 = vrot.slane %v1107_v6, 2  ;;  %v1121_v36 = vmax.f32 %v1119_v14, %v1120_v18 }
 0x281   :  { %v1115_v38 = vrot.slane %v1114_v19, 2  ;;  %v1101_v40 = vrot.slane %v1100_v33, 2  ;;  %v865_v54 = vcombine.low %v848_v53, %v3112_v10  ;;  %v1231_v2 = vsel %vm204_vm0, %v1009_v7, -inf }
 0x282   :  { %v3238_v41 = vmax.f32 %v1207_v16, %v1208_v32  ;;  %v3240_v44 = vmax.f32 %v1228_v17, %v1229_v34  ;;  %v1109_v46 = vmax.f32 %v1107_v6, %v1108_v35  ;;  %v1122_v50 = vrot.slane %v1121_v36, 2 }
 0x283   :  { %v1116_v52 = vmax.f32 %v1114_v19, %v1115_v38  ;;  %v1102_v13 = vmax.f32 %v1100_v33, %v1101_v40  ;;  %v1017_v30 = vrot.slane %v865_v54, %v3062_v43  ;;  %v1232_v29 = vrot.slane %v1231_v2, 4 }
 0x284   :  { %v2283_v51 = vpack.i.bf16 %v3240_v44, %v3238_v41  ;;  %v1110_v61 = vrot.slane %v1109_v46, 1  ;;  %v1123_v25 = vmax.f32 %v1121_v36, %v1122_v50  ;;  %v2020_v10 = vcombine.low %v3102_v3, %v3102_v3 }
 0x285   :  { %v1117_v26 = vrot.slane %v1116_v52, 1  ;;  %v1103_v0 = vrot.slane %v1102_v13, 1  ;;  %v1233_v62 = vmax.f32 %v1231_v2, %v1232_v29  ;;  %v1245_v63 = vsel %vm204_vm0, %v1017_v30, -inf }
 0x286   :  { %2284 = vrot.lane.b32.xlu0 %v2283_v51, %s2382_s14  ;;  %v3249_v1 = vmax.f32 %v1109_v46, %v1110_v61  ;;  %v1124_v27 = vrot.slane %v1123_v25, 1  ;;  %v1246_v58 = vrot.slane %v1245_v63, 4  ;;  %v992_v8 = vrot.slane %v2020_v10, %v3062_v43 }
 0x287   :  { %v3252_v9 = vmax.f32 %v1116_v52, %v1117_v26  ;;  %v3254_v11 = vmax.f32 %v1102_v13, %v1103_v0  ;;  %v1234_v12 = vrot.slane %v1233_v62, 2  ;;  %v993_v14 = vcombine.high %v3199_v22, %v3199_v22 }
 0x288   :  { %v3258_v15 = vmax.f32 %v1123_v25, %v1124_v27  ;;  %v1247_v16 = vmax.f32 %v1245_v63, %v1246_v58  ;;  %v1217_v17 = vsel %vm204_vm0, %v992_v8, -inf  ;;  %v807_v6 = vrot.slane %v798_v60, %v3062_v43 }
 0x289   :  { %v2298_v18 = vpack.i.bf16 %v3252_v9, %v3249_v1  ;;  %v1235_v19 = vmax.f32 %v1233_v62, %v1234_v12  ;;  %v1210_v33 = vsel %vm204_vm0, %v993_v14, -inf  ;;  %v1218_v53 = vrot.slane %v1217_v17, 4 }
 0x28a   :  { %v2288_v22 = vpack.i.bf16 %v3258_v15, %v3254_v11  ;;  %v1248_v7 = vrot.slane %v1247_v16, 2  ;;  %v1211_v32 = vrot.slane %v1210_v33, 4  ;;  %v821_v34 = vrot.slane %v3075_v59, %v3062_v43 }
 0x28b   :  { %2299 = vrot.lane.b32.xlu1 %v2298_v18, %s2382_s14  ;;  %v1236_v35 = vrot.slane %v1235_v19, 1  ;;  %v1219_v55 = vmax.f32 %v1217_v17, %v1218_v53  ;;  %v929_v48 = vcombine.high %v3224_v57, %v3224_v57  ;;  %v2021_v60 = vcombine.high %v3102_v3, %v3102_v3 }
 0x28c   :  { %2289 = vrot.lane.b32.xlu0 %v2288_v22, %s2382_s14  ;;  %v1249_v36 = vmax.f32 %v1247_v16, %v1248_v7  ;;  %v1212_v38 = vmax.f32 %v1210_v33, %v1211_v32  ;;  %v829_v40 = vcombine.low %v807_v6, %v821_v34  ;;  %v1025_v54 = vcombine.high %v1017_v30, %v1017_v30 }
 0x28d   :  { %v3278_v2 = vmax.f32 %v1235_v19, %v1236_v35  ;;  %v1220_v46 = vrot.slane %v1219_v55, 2  ;;  %v1126_v59 = vsel %vm204_vm0, %v929_v48, -inf  ;;  %v1008_v50 = vrot.slane %v2021_v60, %v3062_v43 }
 0x28e   :  { %v1250_v52 = vrot.slane %v1249_v36, 1  ;;  %v1213_v13 = vrot.slane %v1212_v38, 2  ;;  %v937_v57 = vrot.slane %v829_v40, %v3062_v43  ;;  %v1127_v29 = vrot.slane %v1126_v59, 4 }
 0x28f   :  { %v1221_v51 = vmax.f32 %v1219_v55, %v1220_v46  ;;  %v1238_v3 = vsel %vm204_vm0, %v1008_v50, -inf  ;;  %v1252_v61 = vsel %vm204_vm0, %v1025_v54, -inf  ;;  %v2017_v25 = vcombine.low %v821_v34, %v821_v34 }
 0x290   :  { %v3285_v10 = vmax.f32 %v1249_v36, %v1250_v52  ;;  %v1214_v30 = vmax.f32 %v1212_v38, %v1213_v13  ;;  %v1128_v26 = vmax.f32 %v1126_v59, %v1127_v29  ;;  %v1140_v0 = vsel %vm204_vm0, %v937_v57, -inf }
 0x291   :  { %v1222_v62 = vrot.slane %v1221_v51, 1  ;;  %v1141_v63 = vrot.slane %v1140_v0, 4  ;;  %v1239_v27 = vrot.slane %v1238_v3, 4  ;;  %v1253_v58 = vrot.slane %v1252_v61, 4 }
 0x292   :  { %v2303_v8 = vpack.i.bf16 %v3285_v10, %v3278_v2  ;;  %v1215_v12 = vrot.slane %v1214_v30, 1  ;;  %v1129_v14 = vrot.slane %v1128_v26, 2  ;;  %v944_v16 = vrot.slane %v2017_v25, %v3062_v43 }
 0x293   :  { %v3291_v17 = vmax.f32 %v1221_v51, %v1222_v62  ;;  %v1142_v6 = vmax.f32 %v1140_v0, %v1141_v63  ;;  %v1240_v18 = vmax.f32 %v1238_v3, %v1239_v27  ;;  %v1254_v19 = vmax.f32 %v1252_v61, %v1253_v58 }
 0x294   :  { %2304 = vrot.lane.b32.xlu1 %v2303_v8, %s2382_s14  ;;  %v3294_v33 = vmax.f32 %v1214_v30, %v1215_v12  ;;  %v1130_v53 = vmax.f32 %v1128_v26, %v1129_v14  ;;  %v1154_v22 = vsel %vm204_vm0, %v944_v16, -inf  ;;  %v2016_v7 = vcombine.high %v3192_v20, %v3192_v20 }
 0x295   :  { %v1143_v32 = vrot.slane %v1142_v6, 2  ;;  %v1241_v34 = vrot.slane %v1240_v18, 2  ;;  %v1255_v35 = vrot.slane %v1254_v19, 2  ;;  %v1155_v55 = vrot.slane %v1154_v22, 4 }
 0x296   :  { %v2293_v48 = vpack.i.bf16 %v3291_v17, %v3294_v33  ;;  %v1131_v60 = vrot.slane %v1130_v53, 1  ;;  %v928_v36 = vrot.slane %v2016_v7, %v3062_v43  ;;  %v945_v38 = vcombine.high %v937_v57, %v937_v57 }
 0x297   :  { %v1144_v40 = vmax.f32 %v1142_v6, %v1143_v32  ;;  %v1242_v54 = vmax.f32 %v1240_v18, %v1241_v34  ;;  %v1256_v46 = vmax.f32 %v1254_v19, %v1255_v35  ;;  %v1156_v59 = vmax.f32 %v1154_v22, %v1155_v55  ;;  %v1636_v32 = vld [vmem:[%s3804_s5 + $0xf8] sm:$0xff]  ;;  %v1635_v35 = vld [vmem:[%s3804_s5 + $0xf0] sm:$0xff] }
 0x298   :  { %2294 = vrot.lane.b32.xlu0 %v2293_v48, %s2382_s14  ;;  %v3303_v50 = vmax.f32 %v1130_v53, %v1131_v60  ;;  %v1133_v20 = vsel %vm204_vm0, %v928_v36, -inf  ;;  %v1147_v52 = vsel %vm204_vm0, %v945_v38, -inf  ;;  %v1620_v34 = vld [vmem:[%s3804_s5 + $0x78] sm:$0xff]  ;;  %2084 = vmatprep.subr.mxu1 %v1636_v32  ;;  %v1619_v55 = vld [vmem:[%s3804_s5 + $0x70] sm:$0xff]  ;;  %v1634_v48 = vld [vmem:[%s3804_s5 + $0xe8] sm:$0xff] }
 0x299   :  { %v1145_v13 = vrot.slane %v1144_v40, 1  ;;  %v1243_v29 = vrot.slane %v1242_v54, 1  ;;  %v1257_v51 = vrot.slane %v1256_v46, 1  ;;  %v1157_v3 = vrot.slane %v1156_v59, 2  ;;  %2085 = vmatpush3.msra.mxu1 %v1620_v34  ;;  %v1618_v60 = vld [vmem:[%s3804_s5 + $0x68] sm:$0xff]  ;;  %v1633_v36 = vld [vmem:[%s3804_s5 + $0xe0] sm:$0xff] }
 0x29a   :  { %v1134_v61 = vrot.slane %v1133_v20, 4  ;;  %v1148_v25 = vrot.slane %v1147_v52, 4  ;;  %2086 = vmatprep.subr.mxu1 %v1635_v35  ;;  %v1617_v38 = vld [vmem:[%s3804_s5 + $0x60] sm:$0xff]  ;;  %v1650_v32 = vld [vmem:[%s3804_s5 + $0x168] sm:$0xff]  ;;  %v1624_v34 = vld [vmem:[%s3804_s5 + $0x98] sm:$0xff] }
 0x29b   :  { %v3307_v43 = vmax.f32 %v1144_v40, %v1145_v13  ;;  %v3309_v57 = vmax.f32 %v1242_v54, %v1243_v29  ;;  %v3311_v30 = vmax.f32 %v1256_v46, %v1257_v51  ;;  %v1158_v26 = vmax.f32 %v1156_v59, %v1157_v3  ;;  %2087 = vmatpush3.msra.mxu1 %v1619_v55  ;;  %v1632_v40 = vld [vmem:[%s3804_s5 + $0xd8] sm:$0xff]  ;;  %v1651_v13 = vld [vmem:[%s3804_s5 + $0x170] sm:$0xff]  ;;  %v1630_v51 = vld [vmem:[%s3804_s5 + $0xc8] sm:$0xff] }
 0x29c   :  { %v1135_v0 = vmax.f32 %v1133_v20, %v1134_v61  ;;  %v1149_v62 = vmax.f32 %v1147_v52, %v1148_v25  ;;  %2088 = vmatprep.subr.mxu1 %v1634_v48  ;;  %v1668_v54 = vld [vmem:[%s3804_s5 + $0x1f8] sm:$0xff]  ;;  %v1667_v20 = vld [vmem:[%s3804_s5 + $0x1f0] sm:$0xff]  ;;  %v1614_v3 = vld [vmem:[%s3804_s5 + $0x48] sm:$0xff] }
 0x29d   :  { %v2313_v63 = vpack.i.bf16 %v3307_v43, %v3303_v50  ;;  %v2308_v27 = vpack.i.bf16 %v3309_v57, %v3311_v30  ;;  %v1159_v58 = vrot.slane %v1158_v26, 1  ;;  %2089 = vmatpush3.msra.mxu1 %v1618_v60  ;;  %v1616_v46 = vld [vmem:[%s3804_s5 + $0x58] sm:$0xff]  ;;  %2119 = vmatprep.subr.mxu0 %v1668_v54  ;;  %v1631_v52 = vld [vmem:[%s3804_s5 + $0xd0] sm:$0xff]  ;;  %v1629_v61 = vld [vmem:[%s3804_s5 + $0xc0] sm:$0xff] }
 0x29e   :  { %v1136_v8 = vrot.slane %v1135_v0, 2  ;;  %v1150_v12 = vrot.slane %v1149_v62, 2  ;;  %2090 = vmatprep.subr.mxu1 %v1633_v36  ;;  %v1652_v59 = vld [vmem:[%s3804_s5 + $0x178] sm:$0xff]  ;;  %v1615_v29 = vld [vmem:[%s3804_s5 + $0x50] sm:$0xff]  ;;  %v1613_v25 = vld [vmem:[%s3804_s5 + $0x40] sm:$0xff] }
 0x29f   :  { %2314 = vrot.lane.b32.xlu1 %v2313_v63, %s2382_s14  ;;  %2309 = vrot.lane.b32.xlu0 %v2308_v27, %s2382_s14  ;;  %v3319_v6 = vmax.f32 %v1158_v26, %v1159_v58  ;;  %v1628_v26 = vld [vmem:[%s3804_s5 + $0xb8] sm:$0xff]  ;;  %v1611_v63 = vld [vmem:[%s3804_s5 + $0x30] sm:$0xff] }
 0x2a0   :  { %v1137_v14 = vmax.f32 %v1135_v0, %v1136_v8  ;;  %v1151_v16 = vmax.f32 %v1149_v62, %v1150_v12  ;;  %2091 = vmatpush3.msra.mxu1 %v1617_v38  ;;  %2120 = vmatpush3.msra.mxu0 %v1652_v59  ;;  %v1612_v0 = vld [vmem:[%s3804_s5 + $0x38] sm:$0xff]  ;;  %v1627_v62 = vld [vmem:[%s3804_s5 + $0xb0] sm:$0xff]  ;;  %v1626_v27 = vld [vmem:[%s3804_s5 + $0xa8] sm:$0xff] }
 0x2a1   :  { %2092 = vmatprep.subr.mxu1 %v1632_v40  ;;  %2121 = vmatprep.subr.mxu0 %v1667_v20  ;;  %v1610_v58 = vld [vmem:[%s3804_s5 + $0x28] sm:$0xff]  ;;  %v1665_v35 = vld [vmem:[%s3804_s5 + $0x1e0] sm:$0xff]  ;;  %v1608_v55 = vld [vmem:[%s3804_s5 + $0x18] sm:$0xff] }
 0x2a2   :  { %v1138_v18 = vrot.slane %v1137_v14, 1  ;;  %v1152_v19 = vrot.slane %v1151_v16, 1  ;;  %2093 = vmatpush3.msra.mxu1 %v1616_v46  ;;  %2122 = vmatpush3.msra.mxu0 %v1651_v13  ;;  %v1649_v48 = vld [vmem:[%s3804_s5 + $0x160] sm:$0xff] }
 0x2a3   :  { %1324 = vrot.lane.b32.xlu1 %v3319_v6, %s2382_s14  ;;  %2094 = vmatprep.subr.mxu1 %v1631_v52 }
 0x2a4   :  { %v3323_v53 = vmax.f32 %v1137_v14, %v1138_v18  ;;  %v3325_v22 = vmax.f32 %v1151_v16, %v1152_v19  ;;  %2095 = vmatpush3.msra.mxu1 %v1615_v29  ;;  %v1625_v14 = vld [vmem:[%s3804_s5 + $0xa0] sm:$0xff]  ;;  %v1666_v16 = vld [vmem:[%s3804_s5 + $0x1e8] sm:$0xff] }
 0x2a5   :  { %2096 = vmatprep.subr.mxu1 %v1630_v51  ;;  %v1609_v18 = vld [vmem:[%s3804_s5 + $0x20] sm:$0xff]  ;;  %2123 = vmatprep.subr.mxu0 %v1666_v16  ;;  %v1648_v16 = vld [vmem:[%s3804_s5 + $0x158] sm:$0xff] }
 0x2a6   :  { %v2318_v7 = vpack.i.bf16 %v3323_v53, %v3325_v22  ;;  %2097 = vmatpush3.msra.mxu1 %v1614_v3  ;;  %2124 = vmatpush3.msra.mxu0 %v1650_v32 }
 0x2a7   :  { %2098 = vmatprep.subr.mxu1 %v1629_v61  ;;  %2125 = vmatprep.subr.mxu0 %v1665_v35 }
 0x2a8   :  { %2319 = vrot.lane.b32.xlu0 %v2318_v7, %s2382_s14  ;;  %2099 = vmatpush3.msra.mxu1 %v1613_v25 }
 0x2a9   :  { %2100 = vmatprep.subr.mxu1 %v1628_v26  ;;  %2126 = vmatpush3.msra.mxu0 %v1649_v48  ;;  %v1662_v48 = vld [vmem:[%s3804_s5 + $0x1c8] sm:$0xff] }
 0x2aa   :  { %2101 = vmatpush3.msra.mxu1 %v1612_v0 }
 0x2ab   :  { %2102 = vmatprep.subr.mxu1 %v1627_v62 }
 0x2ac   :  { %2103 = vmatpush3.msra.mxu1 %v1611_v63 }
 0x2ad   :  { %2104 = vmatprep.subr.mxu1 %v1626_v27  ;;  %v1607_v27 = vld [vmem:[%s3804_s5 + $0x10] sm:$0xff] }
 0x2ae   :  { %2105 = vmatpush3.msra.mxu1 %v1610_v58 }
 0x2af   :  { %2106 = vmatprep.subr.mxu1 %v1625_v14 }
 0x2b0   :  { %2107 = vmatpush3.msra.mxu1 %v1609_v18 }
 0x2b1   :  { %2108 = vmatprep.subr.mxu1 %v1624_v34 }
 0x2b2   :  { %2109 = vmatpush3.msra.mxu1 %v1608_v55  ;;  %v1663_v55 = vld [vmem:[%s3804_s5 + $0x1d0] sm:$0xff] }
 0x2de   :  { %v3408_v8 = vpop.permute.xlu1 %2254 }
 0x2df   :  { %v2256_v60 = vunpack.i.l.bf16 %v3408_v8  ;;  %v2257_v29 = vunpack.i.h.bf16 %v3408_v8 }
 0x2e0   :  { %v2260_v12 = vpop.permute.xlu0 %2259 }
 0x2e1   :  { %v2262_v19 = vunpack.i.h.bf16 %v2260_v12  ;;  %v2261_v7 = vunpack.i.l.bf16 %v2260_v12  ;;  %v1423_v51 = vmax.f32 %v3138_v23, %v2256_v60  ;;  %v1623_v23 = vld [vmem:[%s3804_s5 + $0x90] sm:$0xff] }
 0x2e2   :  { %2110 = vmatprep.subr.mxu1 %v1623_v23 }
 0x2e3   :  { %v1368_v36 = vsel %vm709_vm5, %v2261_v7, %v2262_v19  ;;  %v2265_v38 = vpop.permute.xlu1 %2264  ;;  %v1369_v25 = vsel %vm709_vm5, %v2262_v19, %v2257_v29  ;;  %v1453_v58 = vmax.f32 %v1423_v51, 0.0  ;;  %2111 = vmatpush3.msra.mxu1 %v1607_v27 }
 0x2e4   :  { %v2270_v40 = vpop.permute.xlu0 %2269  ;;  %v1424_v54 = vmax.f32 %v3142_v28, %v1368_v36  ;;  %v2267_v20 = vunpack.i.h.bf16 %v2265_v38  ;;  %v2266_v52 = vunpack.i.l.bf16 %v2265_v38  ;;  %v1425_v18 = vmax.f32 %v3146_v39, %v1369_v25  ;;  %v1622_v39 = vld [vmem:[%s3804_s5 + $0x88] sm:$0xff] }
 0x2e5   :  { %v2272_v46 = vunpack.i.h.bf16 %v2270_v40  ;;  %v2271_v59 = vunpack.i.l.bf16 %v2270_v40  ;;  %2112 = vmatprep.subr.mxu1 %v1622_v39  ;;  %v1658_v39 = vld [vmem:[%s3804_s5 + $0x1a8] sm:$0xff] }
 0x2e6   :  { %v1454_v13 = vmax.f32 %v1424_v54, 0.0  ;;  %v1367_v28 = vsel %vm709_vm5, %v2267_v20, %v2256_v60  ;;  %v1366_v26 = vsel %vm709_vm5, %v2266_v52, %v2267_v20  ;;  %v1487_v60 = vrot.slane %v1453_v58, 7  ;;  %v1605_v54 = vld [vmem:[%s3804_s5] sm:$0xff]  ;;  %v1644_v58 = vld [vmem:[%s3804_s5 + $0x138] sm:$0xff] }
 0x2e7   :  { %v1358_v3 = vsel %vm709_vm5, %v2271_v59, %v2272_v46  ;;  %v1421_v7 = vmax.f32 %v3150_v42, %v1366_v26  ;;  %v1422_v35 = vmax.f32 %v3161_v37, %v1367_v28  ;;  %v1606_v42 = vld [vmem:[%s3804_s5 + $0x8] sm:$0xff]  ;;  %v1621_v37 = vld [vmem:[%s3804_s5 + $0x80] sm:$0xff]  ;;  %v1455_v59 = vmax.f32 %v1425_v18, 0.0 }
 0x2e8   :  { %v1409_v61 = vmax.f32 %v3152_v45, %v1358_v3  ;;  %v1492_v63 = vrot.slane %v1454_v13, 7  ;;  %v1664_v45 = vld [vmem:[%s3804_s5 + $0x1d8] sm:$0xff]  ;;  %2113 = vmatpush3.msra.mxu1 %v1606_v42  ;;  %v1661_v3 = vld [vmem:[%s3804_s5 + $0x1c0] sm:$0xff]  ;;  %v1642_v42 = vld [vmem:[%s3804_s5 + $0x128] sm:$0xff] }
 0x2e9   :  { %2127 = vmatprep.subr.mxu0 %v1664_v45  ;;  %2114 = vmatprep.subr.mxu1 %v1621_v37  ;;  %v1451_v13 = vmax.f32 %v1421_v7, 0.0  ;;  %v1452_v51 = vmax.f32 %v1422_v35, 0.0  ;;  %v1645_v26 = vld [vmem:[%s3804_s5 + $0x140] sm:$0xff]  ;;  %v1660_v45 = vld [vmem:[%s3804_s5 + $0x1b8] sm:$0xff]  ;;  %v1500_v27 = vrot.slane %v1455_v59, 7 }
 0x2ea   :  { %v3446_v0 = vpop.permute.xlu1 %2279  ;;  %v1439_v62 = vmax.f32 %v1409_v61, 0.0  ;;  %2128 = vmatpush3.msra.mxu0 %v1648_v16  ;;  %2115 = vmatpush3.msra.mxu1 %v1605_v54  ;;  %v1700_v61 = vld [vmem:[%s3804_s5 + $0x2f8] sm:$0xff] }
 0x2eb   :  { %v2282_v12 = vunpack.i.h.bf16 %v3446_v0  ;;  %v2281_v14 = vunpack.i.l.bf16 %v3446_v0  ;;  %2129 = vmatprep.subr.mxu0 %v1663_v55  ;;  %2154 = vmatprep.subr.mxu1 %v1700_v61  ;;  %v1477_v7 = vrot.slane %v1452_v51, 7 }
 0x2ec   :  { %v3464_v19 = vsel %vm1469_vm6, %v1492_v63, %v1439_v62 }
 0x2ed   :  { %v1359_v32 = vsel %vm709_vm5, %v2272_v46, %v2282_v12  ;;  %v1408_v34 = vmax.f32 %v3194_v49, %v2281_v14  ;;  %1494 = vrot.lane.b32.xlu0 %v3464_v19, %s2383_s15  ;;  %v1647_v49 = vld [vmem:[%s3804_s5 + $0x150] sm:$0xff]  ;;  %v1646_v46 = vld [vmem:[%s3804_s5 + $0x148] sm:$0xff] }
 0x2ee   :  { %v1410_v36 = vmax.f32 %v3163_v56, %v1359_v32  ;;  %2130 = vmatpush3.msra.mxu0 %v1647_v49  ;;  %v1657_v49 = vld [vmem:[%s3804_s5 + $0x1a0] sm:$0xff] }
 0x2ef   :  { %v1438_v38 = vmax.f32 %v1408_v34, 0.0  ;;  %v2275_v40 = vpop.permute.xlu0 %2274  ;;  %2131 = vmatprep.subr.mxu0 %v1662_v48 }
 0x2f0   :  { %v2277_v20 = vunpack.i.h.bf16 %v2275_v40  ;;  %v2276_v52 = vunpack.i.l.bf16 %v2275_v40  ;;  %2132 = vmatpush3.msra.mxu0 %v1646_v46  ;;  %v1440_v62 = vmax.f32 %v1410_v36, 0.0  ;;  %v3546_v37 = vpop.permute.xlu1 %1354 }
 0x2f1   :  { %v3500_v56 = vsel %vm1469_vm6, %v1487_v60, %v1438_v38  ;;  %2133 = vmatprep.subr.mxu0 %v1661_v3  ;;  %v3560_v3 = vmax.f32 %v3140_v24, %v2257_v29  ;;  %v1435_v8 = vmax.f32 %v3226_v5, %v3546_v37 }
 0x2f2   :  { %v1357_v25 = vsel %vm709_vm5, %v2277_v20, %v2281_v14  ;;  %v1356_v28 = vsel %vm709_vm5, %v2276_v52, %v2277_v20  ;;  %2134 = vmatpush3.msra.mxu0 %v1645_v26  ;;  %v1468_v14 = vrot.slane %v1451_v13, 7  ;;  %v3532_v35 = vsel %vm1469_vm6, %v1500_v27, %v1440_v62  ;;  %v1641_v20 = vld [vmem:[%s3804_s5 + $0x120] sm:$0xff] }
 0x2f3   :  { %v1406_v63 = vmax.f32 %v3212_v47, %v1356_v28  ;;  %v1407_v23 = vmax.f32 %v3214_v31, %v1357_v25  ;;  %2135 = vmatprep.subr.mxu0 %v1660_v45  ;;  %v1659_v47 = vld [vmem:[%s3804_s5 + $0x1b0] sm:$0xff] }
 0x2f4   :  { %2136 = vmatpush3.msra.mxu0 %v1644_v58  ;;  %v1643_v31 = vld [vmem:[%s3804_s5 + $0x130] sm:$0xff] }
 0x2f5   :  { %v1436_v16 = vmax.f32 %v1406_v63, 0.0  ;;  %v1437_v18 = vmax.f32 %v1407_v23, 0.0  ;;  %2137 = vmatprep.subr.mxu0 %v1659_v47 }
 0x2f6   :  { %2138 = vmatpush3.msra.mxu0 %v1643_v31 }
 0x2f7   :  { %v1478_v32 = vsel %vm1469_vm6, %v1477_v7, %v1437_v18  ;;  %v3529_v34 = vsel %vm1469_vm6, %v1468_v14, %v1436_v16  ;;  %2139 = vmatprep.subr.mxu0 %v1658_v39 }
 0x2f8   :  { %1479 = vrot.lane.b32.xlu0 %v1478_v32, %s2381_s2  ;;  %v2323_v55 = vpack.i.bf16 %v3532_v35, %v3529_v34  ;;  %2140 = vmatpush3.msra.mxu0 %v1642_v42  ;;  %v2285_v48 = vpop.permute.xlu0 %2284 }
 0x2f9   :  { %2141 = vmatprep.subr.mxu0 %v1657_v49  ;;  %v2287_v54 = vunpack.i.h.bf16 %v2285_v48  ;;  %v2286_v61 = vunpack.i.l.bf16 %v2285_v48 }
 0x2fa   :  { %2324 = vrot.lane.b32.xlu1 %v2323_v55, %s2382_s14  ;;  %2142 = vmatpush3.msra.mxu0 %v1641_v20 }
 0x2fd   :  { %v2300_v60 = vpop.permute.xlu1 %2299 }
 0x2fe   :  { %1482 = vrot.lane.b32.xlu1 %v1478_v32, %s2383_s15  ;;  %v2290_v36 = vpop.permute.xlu0 %2289  ;;  %v2302_v46 = vunpack.i.h.bf16 %v2300_v60  ;;  %v2301_v59 = vunpack.i.l.bf16 %v2300_v60  ;;  %v1465_v32 = vmax.f32 %v1435_v8, 0.0 }
 0x2ff   :  { %v2291_v52 = vunpack.i.l.bf16 %v2290_v36  ;;  %v2292_v39 = vunpack.i.h.bf16 %v2290_v36 }
 0x300   :  { %v1414_v26 = vmax.f32 %v3252_v9, %v2302_v46  ;;  %v1361_v62 = vsel %vm709_vm5, %v2301_v59, %v2302_v46  ;;  %v1456_v9 = vmax.f32 %v3560_v3, 0.0 }
 0x301   :  { %v1360_v24 = vsel %vm709_vm5, %v2291_v52, %v2301_v59  ;;  %v1413_v5 = vmax.f32 %v3249_v1, %v1361_v62  ;;  %v1639_v1 = vld [vmem:[%s3804_s5 + $0x110] sm:$0xff] }
 0x302   :  { %v1444_v7 = vmax.f32 %v1414_v26, 0.0  ;;  %v1412_v47 = vmax.f32 %v3254_v11, %v1360_v24  ;;  %v1510_v8 = vrot.slane %v1456_v9, 7 }
 0x304   :  { %v1442_v52 = vmax.f32 %v1412_v47, 0.0 }
 0x306   :  { %v3550_v38 = vpop.permute.xlu1 %2304 }
 0x307   :  { %v2306_v40 = vunpack.i.l.bf16 %v3550_v38  ;;  %v2307_v46 = vunpack.i.h.bf16 %v3550_v38 }
 0x309   :  { %v1372_v13 = vsel %vm709_vm5, %v2287_v54, %v2306_v40  ;;  %v1443_v54 = vmax.f32 %v1413_v5, 0.0 }
 0x30a   :  { %v2295_v51 = vpop.permute.xlu0 %2294  ;;  %v1430_v63 = vmax.f32 %v3240_v44, %v1372_v13  ;;  %v1656_v44 = vld [vmem:[%s3804_s5 + $0x198] sm:$0xff] }
 0x30b   :  { %v2297_v25 = vunpack.i.h.bf16 %v2295_v51  ;;  %v2296_v28 = vunpack.i.l.bf16 %v2295_v51  ;;  %2143 = vmatprep.subr.mxu0 %v1656_v44 }
 0x30c   :  { %v1460_v0 = vmax.f32 %v1430_v63, 0.0 }
 0x30d   :  { %v1429_v23 = vmax.f32 %v3291_v17, %v2297_v25  ;;  %v1370_v45 = vsel %vm709_vm5, %v2286_v61, %v2296_v28  ;;  %v1371_v27 = vsel %vm709_vm5, %v2296_v28, %v2297_v25  ;;  %v3580_v17 = vmax.f32 %v3196_v21, %v2282_v12  ;;  %v1654_v61 = vld [vmem:[%s3804_s5 + $0x188] sm:$0xff] }
 0x30e   :  { %v1427_v29 = vmax.f32 %v3238_v41, %v1370_v45  ;;  %v1428_v58 = vmax.f32 %v3294_v33, %v1371_v27  ;;  %v1640_v41 = vld [vmem:[%s3804_s5 + $0x118] sm:$0xff]  ;;  %v1655_v33 = vld [vmem:[%s3804_s5 + $0x190] sm:$0xff]  ;;  %v1542_v13 = vrot.slane %v1460_v0, 7  ;;  %v1637_v27 = vld [vmem:[%s3804_s5 + $0x100] sm:$0xff] }
 0x30f   :  { %v1459_v14 = vmax.f32 %v1429_v23, 0.0  ;;  %2144 = vmatpush3.msra.mxu0 %v1640_v41  ;;  %v1441_v63 = vmax.f32 %v3580_v17, 0.0  ;;  %v1597_v23 = vrot.slane %v1465_v32, 7 }
 0x310   :  { %v1457_v16 = vmax.f32 %v1427_v29, 0.0  ;;  %v1458_v18 = vmax.f32 %v1428_v58, 0.0  ;;  %2145 = vmatprep.subr.mxu0 %v1655_v33 }
 0x311   :  { %v1535_v31 = vrot.slane %v1459_v14, 7  ;;  %v3590_v21 = vpop.permute.xlu1 %2314  ;;  %v2310_v12 = vpop.permute.xlu0 %2309  ;;  %2146 = vmatpush3.msra.mxu0 %v1639_v1 }
 0x312   :  { %v1527_v55 = vrot.slane %v1458_v18, 7  ;;  %v2316_v42 = vunpack.i.l.bf16 %v3590_v21  ;;  %v1517_v49 = vrot.slane %v1457_v16, 7  ;;  %v2312_v48 = vunpack.i.h.bf16 %v2310_v12  ;;  %2147 = vmatprep.subr.mxu0 %v1654_v61 }
 0x313   :  { %v2311_v60 = vunpack.i.l.bf16 %v2310_v12  ;;  %v1536_v11 = vsel %vm1469_vm6, %v1535_v31, %v1444_v7 }
 0x314   :  { %v1362_v59 = vsel %vm709_vm5, %v2292_v39, %v2316_v42  ;;  %v2333_v20 = vpack.i.bf16 %v1536_v11, %v3532_v35  ;;  %v1373_v51 = vsel %vm709_vm5, %v2306_v40, %v2312_v48  ;;  %v3611_v35 = vsel %vm1469_vm6, %v1527_v55, %v1443_v54  ;;  %v1653_v40 = vld [vmem:[%s3804_s5 + $0x180] sm:$0xff] }
 0x315   :  { %v1415_v36 = vmax.f32 %v3258_v15, %v1362_v59  ;;  %v1325_v3 = vpop.permute.xlu1 %1324  ;;  %v1374_v25 = vsel %vm709_vm5, %v2307_v46, %v2311_v60  ;;  %v1375_v38 = vsel %vm709_vm5, %v2311_v60, %v3546_v37  ;;  %v1638_v15 = vld [vmem:[%s3804_s5 + $0x108] sm:$0xff]  ;;  %v1431_v62 = vmax.f32 %v3278_v2, %v1373_v51 }
 0x316   :  { %v1420_v28 = vmax.f32 %v3319_v6, %v1325_v3  ;;  %2334 = vrot.lane.b32.xlu1 %v2333_v20, %s2381_s2  ;;  %v1434_v37 = vmax.f32 %v3311_v30, %v1375_v38  ;;  %v1518_v6 = vsel %vm1469_vm6, %v1517_v49, %v1442_v52  ;;  %2148 = vmatpush3.msra.mxu0 %v1638_v15  ;;  %v2317_v2 = vunpack.i.h.bf16 %v3590_v21  ;;  %v1698_v15 = vld [vmem:[%s3804_s5 + $0x2e8] sm:$0xff] }
 0x317   :  { %v1445_v26 = vmax.f32 %v1415_v36, 0.0  ;;  %v1433_v29 = vmax.f32 %v3285_v10, %v1374_v25  ;;  %2149 = vmatprep.subr.mxu0 %v1653_v40  ;;  %v1461_v17 = vmax.f32 %v1431_v62, 0.0  ;;  %v1432_v9 = vmax.f32 %v3309_v57, %v2312_v48  ;;  %v1682_v40 = vld [vmem:[%s3804_s5 + $0x268] sm:$0xff]  ;;  %v1681_v62 = vld [vmem:[%s3804_s5 + $0x260] sm:$0xff] }
 0x318   :  { %v1450_v45 = vmax.f32 %v1420_v28, 0.0  ;;  %2150 = vmatpush3.msra.mxu0 %v1637_v27  ;;  %v1464_v5 = vmax.f32 %v1434_v37, 0.0  ;;  %v1511_v10 = vsel %vm1469_vm6, %v1510_v8, %v1441_v63  ;;  %v1696_v37 = vld [vmem:[%s3804_s5 + $0x2d8] sm:$0xff]  ;;  %v1695_v63 = vld [vmem:[%s3804_s5 + $0x2d0] sm:$0xff]  ;;  %v1678_v27 = vld [vmem:[%s3804_s5 + $0x248] sm:$0xff] }
 0x319   :  { %v1543_v24 = vsel %vm1469_vm6, %v1542_v13, %v1445_v26  ;;  %2235 = vmatprep.subr.mxu0 %v2379_v4  ;;  %v1463_v47 = vmax.f32 %v1433_v29, 0.0  ;;  %v2338_v21 = vpack.i.bf16 %v1518_v6, %v1511_v10  ;;  %v1564_v12 = vrot.slane %v1461_v17, 7  ;;  %v1697_v26 = vld [vmem:[%s3804_s5 + $0x2e0] sm:$0xff]  ;;  %v1692_v29 = vld [vmem:[%s3804_s5 + $0x2b8] sm:$0xff]  ;;  %v1674_v17 = vld [vmem:[%s3804_s5 + $0x228] sm:$0xff] }
 0x31a   :  { %v2320_v30 = vpop.permute.xlu0 %2319  ;;  %v2328_v58 = vpack.i.bf16 %v1543_v24, %v3611_v35  ;;  %v2343_v14 = vpack.i.bf16 %v1543_v24, %v1518_v6  ;;  %v3631_v44 = vsel %vm1469_vm6, %v1597_v23, %v1450_v45  ;;  %v1587_v1 = vrot.slane %v1464_v5, 7  ;;  %v1680_v6 = vld [vmem:[%s3804_s5 + $0x258] sm:$0xff]  ;;  %v1679_v23 = vld [vmem:[%s3804_s5 + $0x250] sm:$0xff]  ;;  %v1694_v45 = vld [vmem:[%s3804_s5 + $0x2c8] sm:$0xff] }
 0x31b   :  { %v2322_v16 = vunpack.i.h.bf16 %v2320_v30  ;;  %v2321_v18 = vunpack.i.l.bf16 %v2320_v30  ;;  %v1579_v49 = vrot.slane %v1463_v47, 7  ;;  %v1462_v48 = vmax.f32 %v1432_v9, 0.0  ;;  %v1693_v8 = vld [vmem:[%s3804_s5 + $0x2c0] sm:$0xff]  ;;  %v1691_v30 = vld [vmem:[%s3804_s5 + $0x2b0] sm:$0xff]  ;;  %v1672_v9 = vld [vmem:[%s3804_s5 + $0x218] sm:$0xff] }
 0x31c   :  { %2329 = vrot.lane.b32.xlu0 %v2328_v58, %s2382_s14  ;;  %2344 = vrot.lane.b32.xlu1 %v2343_v14, %s2381_s2  ;;  %v1677_v24 = vld [vmem:[%s3804_s5 + $0x240] sm:$0xff]  ;;  %v1675_v58 = vld [vmem:[%s3804_s5 + $0x230] sm:$0xff] }
 0x31d   :  { %v1363_v41 = vsel %vm709_vm5, %v2316_v42, %v2322_v16  ;;  %v1364_v33 = vsel %vm709_vm5, %v2317_v2, %v2321_v18  ;;  %v1365_v7 = vsel %vm709_vm5, %v2321_v18, %v1325_v3  ;;  %v1417_v32 = vmax.f32 %v3323_v53, %v2322_v16  ;;  %v1676_v2 = vld [vmem:[%s3804_s5 + $0x238] sm:$0xff]  ;;  %v1690_v14 = vld [vmem:[%s3804_s5 + $0x2a8] sm:$0xff]  ;;  %v1689_v5 = vld [vmem:[%s3804_s5 + $0x2a0] sm:$0xff] }
 0x31e   :  { %v1416_v0 = vmax.f32 %v3303_v50, %v1363_v41  ;;  %v1419_v31 = vmax.f32 %v3325_v22, %v1365_v7  ;;  %v1418_v57 = vmax.f32 %v3307_v43, %v1364_v33  ;;  %v1572_v53 = vrot.slane %v1462_v48, 7  ;;  %v1673_v16 = vld [vmem:[%s3804_s5 + $0x220] sm:$0xff]  ;;  %v1688_v18 = vld [vmem:[%s3804_s5 + $0x298] sm:$0xff]  ;;  %v1687_v10 = vld [vmem:[%s3804_s5 + $0x290] sm:$0xff] }
 0x31f   :  { %v1447_v11 = vmax.f32 %v1417_v32, 0.0  ;;  %v1671_v41 = vld [vmem:[%s3804_s5 + $0x210] sm:$0xff]  ;;  %v1686_v7 = vld [vmem:[%s3804_s5 + $0x288] sm:$0xff] }
 0x320   :  { %v1446_v39 = vmax.f32 %v1416_v0, 0.0  ;;  %v1449_v55 = vmax.f32 %v1419_v31, 0.0  ;;  %2339 = vrot.lane.b32.xlu0 %v2338_v21, %s2383_s15  ;;  %v1448_v42 = vmax.f32 %v1418_v57, 0.0  ;;  %v1670_v47 = vld [vmem:[%s3804_s5 + $0x208] sm:$0xff]  ;;  %v1685_v0 = vld [vmem:[%s3804_s5 + $0x280] sm:$0xff] }
 0x321   :  { %v1573_v54 = vsel %vm1469_vm6, %v1572_v53, %v1447_v11  ;;  %v1669_v21 = vld [vmem:[%s3804_s5 + $0x200] sm:$0xff] }
 0x322   :  { %v3647_v60 = vsel %vm1469_vm6, %v1564_v12, %v1446_v39  ;;  %v1588_v50 = vsel %vm1469_vm6, %v1587_v1, %v1449_v55  ;;  %v3652_v43 = vsel %vm1469_vm6, %v1579_v49, %v1448_v42 }
 0x323   :  { %v2348_v22 = vpack.i.bf16 %v1588_v50, %v3647_v60 }
 0x324   :  { %1582 = vrot.lane.b32.xlu0 %v3652_v43, %s2382_s14 }
 0x325   :  { %2349 = vrot.lane.b32.xlu1 %v2348_v22, %s2383_s15 }
 0x328   :  { %1589 = vrot.lane.b32.xlu0 %v1588_v50, %s2381_s2 }
 0x329   :  { %1574 = vrot.lane.b32.xlu1 %v1573_v54, %s2382_s14 }
 0x35f   :  { %v1495_v46 = vpop.permute.xlu0 %1494 }
 0x360   :  { %v1550_v59 = vsel %vm705_vm3, %v3500_v56, %v1495_v46  ;;  %v1684_v56 = vld [vmem:[%s3804_s5 + $0x278] sm:$0xff] }
 0x361   :  { %v1551_v36 = vsel %vm707_vm4, %v1550_v59, %v3464_v19  ;;  %v1699_v19 = vld [vmem:[%s3804_s5 + $0x2f0] sm:$0xff] }
 0x36a   :  { %v1480_v51 = vpop.permute.xlu0 %1479 }
 0x36c   :  { %v2325_v20 = vpop.permute.xlu1 %2324 }
 0x36d   :  { %v2327_v52 = vunpack.i.h.bf16 %v2325_v20  ;;  %v2326_v13 = vunpack.i.l.bf16 %v2325_v20 }
 0x36f   :  { %v1547_v3 = vsel %vm705_vm3, %v3529_v34, %v2326_v13  ;;  %v1552_v61 = vsel %vm709_vm5, %v1551_v36, %v2327_v52  ;;  %v1683_v34 = vld [vmem:[%s3804_s5 + $0x270] sm:$0xff] }
 0x370   :  { %v1483_v25 = vpop.permute.xlu1 %1482  ;;  %v1548_v38 = vsel %vm707_vm4, %v1547_v3, %v1480_v51  ;;  %1771 = vmatprep.mubr.f32.mxu1 %v1552_v61  ;;  %v1703_v36 = vld [vmem:[%s3804_s5 + $0x310] sm:$0xff] }
 0x371   :  { %v1549_v28 = vsel %vm709_vm5, %v1548_v38, %v1483_v25  ;;  %v1702_v38 = vld [vmem:[%s3804_s5 + $0x308] sm:$0xff] }
 0x372   :  { %1772 = vmatmul.mubr.f32.vlgmr.msra.gmra.mxu1 %v1549_v28 }
 0x373   :  { %2155 = vmatpush3.msra.mxu1 %v1684_v56 }
 0x374   :  { %2156 = vmatprep.subr.mxu1 %v1699_v19 }
 0x375   :  { %2157 = vmatpush3.msra.mxu1 %v1683_v34  ;;  %v1701_v34 = vld [vmem:[%s3804_s5 + $0x300] sm:$0xff] }
 0x376   :  { %2158 = vmatprep.subr.mxu1 %v1698_v15 }
 0x377   :  { %2159 = vmatpush3.msra.mxu1 %v1682_v40 }
 0x378   :  { %2160 = vmatprep.subr.mxu1 %v1697_v26 }
 0x379   :  { %2161 = vmatpush3.msra.mxu1 %v1681_v62 }
 0x37a   :  { %2162 = vmatprep.subr.mxu1 %v1696_v37 }
 0x37b   :  { %2163 = vmatpush3.msra.mxu1 %v1680_v6 }
 0x37c   :  { %2164 = vmatprep.subr.mxu1 %v1695_v63 }
 0x37d   :  { %2165 = vmatpush3.msra.mxu1 %v1679_v23 }
 0x37e   :  { %2166 = vmatprep.subr.mxu1 %v1694_v45 }
 0x37f   :  { %2167 = vmatpush3.msra.mxu1 %v1678_v27 }
 0x380   :  { %2168 = vmatprep.subr.mxu1 %v1693_v8 }
 0x381   :  { %2169 = vmatpush3.msra.mxu1 %v1677_v24 }
 0x382   :  { %2170 = vmatprep.subr.mxu1 %v1692_v29 }
 0x383   :  { %2171 = vmatpush3.msra.mxu1 %v1676_v2 }
 0x384   :  { %2172 = vmatprep.subr.mxu1 %v1691_v30 }
 0x385   :  { %2173 = vmatpush3.msra.mxu1 %v1675_v58 }
 0x386   :  { %2174 = vmatprep.subr.mxu1 %v1690_v14 }
 0x387   :  { %2175 = vmatpush3.msra.mxu1 %v1674_v17 }
 0x388   :  { %2176 = vmatprep.subr.mxu1 %v1689_v5  ;;  %v2335_v33 = vpop.permute.xlu1 %2334 }
 0x389   :  { %2177 = vmatpush3.msra.mxu1 %v1673_v16  ;;  %v2337_v12 = vunpack.i.h.bf16 %v2335_v33  ;;  %v2336_v49 = vunpack.i.l.bf16 %v2335_v33 }
 0x38a   :  { %2178 = vmatprep.subr.mxu1 %v1688_v18 }
 0x38b   :  { %2179 = vmatpush3.msra.mxu1 %v1672_v9 }
 0x38c   :  { %2180 = vmatprep.subr.mxu1 %v1687_v10 }
 0x38d   :  { %2181 = vmatpush3.msra.mxu1 %v1671_v41 }
 0x38e   :  { %v2330_v31 = vpop.permute.xlu0 %2329  ;;  %2182 = vmatprep.subr.mxu1 %v1686_v7  ;;  %v2345_v32 = vpop.permute.xlu1 %2344 }
 0x38f   :  { %v2331_v57 = vunpack.i.l.bf16 %v2330_v31  ;;  %2183 = vmatpush3.msra.mxu1 %v1670_v47  ;;  %v2332_v1 = vunpack.i.h.bf16 %v2330_v31  ;;  %v2346_v22 = vunpack.i.l.bf16 %v2345_v32  ;;  %v2347_v52 = vunpack.i.h.bf16 %v2345_v32 }
 0x390   :  { %2184 = vmatprep.subr.mxu1 %v1685_v0 }
 0x391   :  { %v1556_v39 = vsel %vm705_vm3, %v3611_v35, %v2331_v57  ;;  %2185 = vmatpush3.msra.mxu1 %v1669_v21  ;;  %v1704_v35 = vld [vmem:[%s3804_s5 + $0x318] sm:$0xff]  ;;  %s2385_s5 = smov [#allocation2]  }
 0x392   :  { %v2340_v55 = vpop.permute.xlu0 %2339  ;;  %v1557_v42 = vsel %vm707_vm4, %v1556_v39, %v2337_v12  ;;  %s1996_s26 = sshll.u32 %s2385_s5, 4  ;;  %s1997_s26 = int_to_ptr.vmem [resolvable:$true] %s1996_s26 }
 0x393   :  { %v2341_v48 = vunpack.i.l.bf16 %v2340_v55  ;;  %v1558_v50 = vsel %vm709_vm5, %v1557_v42, %v2332_v1  ;;  %v2342_v11 = vunpack.i.h.bf16 %v2340_v55  ;;  %s2357_s27 = scalar_lea.vmem %s1997_s26, 32  ;;  %p2362_p1 = scmp.lt.s32.totalorder %s1997_s26, %s1997_s26 }
 0x394   :  { %1841 = vmatprep.mubr.f32.mxu0 %v1558_v50  ;;  %p2358_p0 = scmp.ne.s32.totalorder %s1997_s26, %s2357_s27  ;;  %p2363_p2 = scmp.lt.s32.totalorder %s2357_s27, %s2357_s27 }
 0x395   :  { %v1553_v53 = vsel %vm705_vm3, %v2336_v49, %v2341_v48 }
 0x396   :  { %v1583_v54 = vpop.permute.xlu0 %1582  ;;  %v1554_v46 = vsel %vm707_vm4, %v1553_v53, %v2346_v22  ;;  %p2364_p3 = por %p2363_p2, %p2362_p1 }
 0x397   :  { %v2350_v59 = vpop.permute.xlu1 %2349  ;;  %v1555_v20 = vsel %vm709_vm5, %v1554_v46, %v2342_v11  ;;  %v1602_v3 = vsel %vm705_vm3, %v3652_v43, %v1583_v54 }
 0x398   :  { %v2351_v13 = vunpack.i.l.bf16 %v2350_v59  ;;  %1842 = vmatmul.mubr.f32.vlgmr.msra.gmra.mxu0 %v1555_v20  ;;  %v2352_v51 = vunpack.i.h.bf16 %v2350_v59  ;;  %p2365_p4 = pnand %p2364_p3, %p2358_p0 }
 0x399   :  { %2236 = vmatpush3.msra.mxu0 %v1704_v35  ;;  %2243 = vmatprep.mubr.msk.f32.mxu0 %vm2380_vm2, %v2379_v4 }
 0x39a   :  { %v1599_v61 = vsel %vm705_vm3, %v2347_v52, %v2351_v13  ;;  %2237 = vmatprep.subr.mxu0 %v2379_v4  ;;  %v1590_v25 = vpop.permute.xlu0 %1589 }
 0x39b   :  { %v1575_v56 = vpop.permute.xlu1 %1574  ;;  %v1600_v28 = vsel %vm707_vm4, %v1599_v61, %v3647_v60  ;;  %v1603_v19 = vsel %vm707_vm4, %v1602_v3, %v1590_v25  ;;  %2238 = vmatpush3.msra.mxu0 %v1703_v36 }
 0x39c   :  { %2239 = vmatprep.subr.mxu0 %v2379_v4  ;;  %v1604_v43 = vsel %vm709_vm5, %v1603_v19, %v2352_v51  ;;  %v1601_v15 = vsel %vm709_vm5, %v1600_v28, %v1575_v56 }
 0x39d   :  { %2240 = vmatpush3.msra.mxu0 %v1702_v38  ;;  %1911 = vmatprep.mubr.f32.mxu1 %v1604_v43 }
 0x39e   :  { %2241 = vmatprep.subr.mxu0 %v2379_v4  ;;  %1912 = vmatmul.mubr.f32.vlgmr.msra.gmra.mxu1 %v1601_v15 }
 0x39f   :  { %2242 = vmatpush3.msra.mxu0 %v1701_v34 }
 0x3a0   :  { %2244 = vmatmul.mubr.msk.f32.vlgmr.msra.gmra.mxu0 %vm705_vm3, %v3631_v44 }
 0x432   :  { %v2116_v60 = vpop.f32.mrf.mxu1 }
 0x434   :  { %v2117_v62 = vpop.f32.mrf.mxu1 }
 0x435   :  { %v2118_v63 = vadd.f32 %v2117_v62, %v2116_v60 }
 0x458   :  { %v2151_v40 = vpop.f32.mrf.mxu0 }
 0x45a   :  { %v2152_v26 = vpop.f32.mrf.mxu0 }
 0x45b   :  { %v2153_v37 = vadd.f32 %v2152_v26, %v2151_v40 }
 0x45d   :  { %v1844_v27 = vadd.f32 %v2153_v37, %v2118_v63 }
 0x45e   :  { %v2186_v6 = vpop.f32.mrf.mxu1 }
 0x460   :  { %v1983_v23 = vpop.f32.mrf.mxu0  ;;  %v2187_v45 = vpop.f32.mrf.mxu1 }
 0x461   :  { %v2188_v8 = vadd.f32 %v2187_v45, %v2186_v6 }
 0x462   :  { %v2245_v24 = vpop.f32.mrf.mxu0 }
 0x463   :  { %v1914_v29 = vadd.f32 %v2188_v8, %v1844_v27 }
 0x465   :  { %v1984_v2 = vadd.f32 %v1983_v23, %v1914_v29 }
 0x467   :  { %2355 = vtanh.f32 %v1984_v2 }
 0x474   :  { %v2356_v4 = vpop.eup %2355 }
 0x475   :  { %1989 = vst.msk [vmem:[#allocation2] sm:$0x3] %vm1988_vm7, %v2356_v4 }
 0x476   :  { %2368 = shalt.err (!%p2365_p4)
}
 0x477   :  { %1999 = dma.vmem_to_hbm [thread:$0]  %s1997_s26, 32, %s3805_s6, [#allocation3]  }
 0x478   :  { %2377 = dma.done.wait [#allocation3], 32  }
 0x479   :  { %2378 = vsyncadd [#allocation3], 4294967264 }
 0x47a   :  { %2003 = vsyncpa [#allocation3], 1 }

</bundles_post_ra>
